<compile_context>
chip_gen: v7x
topology: tpu7x:2x2x1
jax: 0.10.0
libtpu: 0.0.40
codegen_flags: <defaults>
</compile_context>

<pallas_src>
import jax
import jax.numpy as jnp
from jax.experimental import pallas as pl
from jax.experimental.pallas import tpu as pltpu

_BLOCK_COUT = 128


def _mul_conv1x1_kernel(w_ref, s_ref, x_ref, o_ref):
    # w_ref: (BLOCK_COUT, K) bf16, s_ref: (1, K) bf16, x_ref: (K, HW) bf16.
    # Gate the weight rows (sublane-broadcast of the (1, K) row, cheap VPU work),
    # then one MXU matmul with f32 accumulation:
    #   (w * s) @ x  ==  w @ (diag(s) x)  ==  conv1x1(x * s)
    w_gated = w_ref[...] * s_ref[...]
    o_ref[...] = jnp.dot(w_gated, x_ref[...],
                         preferred_element_type=jnp.float32)


def mul_conv2d_1x1(x_nchw, scale_nc11, weight_oi11):
    """x: (1, C_in, H, W); scale: (1, C_in, 1, 1); weight: (C_out, C_in, 1, 1)."""
    N, C_in, H, W = x_nchw.shape
    C_out = weight_oi11.shape[0]
    # TODO(synk): N > 1 would need the batch folded into a grid axis; module uses N == 1.
    assert N == 1 and scale_nc11.shape == (1, C_in, 1, 1)
    HW = H * W

    # Free (contiguous) reshapes -- no transpose, no pad, no slice. bf16 for the MXU.
    x_mat = x_nchw.reshape(C_in, HW).astype(jnp.bfloat16)            # (K, HW)
    s_row = scale_nc11.reshape(1, C_in).astype(jnp.bfloat16)         # (1, K)
    w_mat = weight_oi11.reshape(C_out, C_in).astype(jnp.bfloat16)    # (C_out, K)

    grid = (pl.cdiv(C_out, _BLOCK_COUT),)   # 344 -> 3 tiles (128, 128, 88-ragged)

    out = pl.pallas_call(
        _mul_conv1x1_kernel,
        out_shape=jax.ShapeDtypeStruct((C_out, HW), jnp.float32),
        grid=grid,
        in_specs=[
            pl.BlockSpec((_BLOCK_COUT, C_in), lambda j: (j, 0)),  # weight tile (pipelined)
            pl.BlockSpec((1, C_in), lambda j: (0, 0)),            # gate (resident, same block)
            pl.BlockSpec((C_in, HW), lambda j: (0, 0)),           # activations (resident)
        ],
        out_specs=pl.BlockSpec((_BLOCK_COUT, HW), lambda j: (j, 0)),
        compiler_params=pltpu.CompilerParams(
            dimension_semantics=("parallel",),   # shard C_out tiles across TCs on v7x
            # no vmem_limit_bytes: live buffers are ~2 MiB, well under every
            # generation's scoped default (incl. v7x's 32/64 MiB).
        ),
    )(w_mat, s_row, x_mat)

    # (C_out, HW) is already channel-major -> NCHW via a free reshape.
    return out.reshape(N, C_out, H, W)


if __name__ == "__main__":
    key = jax.random.PRNGKey(0)
    k1, k2, k3 = jax.random.split(key, 3)

    # Shapes from the PyTorch module.
    N, C_in, H, W = 1, 2064, 7, 7
    C_out = 344

    x612 = jax.random.normal(k1, (N, C_in, H, W), dtype=jnp.float32)
    x617 = jax.random.normal(k2, (N, C_in, 1, 1), dtype=jnp.float32)
    # Deterministic init of Conv2d(2064, 344, 1x1, bias=False) weight.
    fan_in = C_in
    bound = 1.0 / (fan_in ** 0.5)
    w = jax.random.uniform(k3, (C_out, C_in, 1, 1), dtype=jnp.float32,
                           minval=-bound, maxval=bound)

    fn = jax.jit(mul_conv2d_1x1)
    out = jax.block_until_ready(fn(x612, x617, w))

    # Pure-JAX f32 reference (elementwise mul + 1x1 conv as matmul).
    gated = x612 * x617
    ref = jnp.einsum("nchw,oc->nohw", gated, w.reshape(C_out, C_in))
    assert out.shape == (N, C_out, H, W)
    # bf16 MXU inputs with f32 accumulation -> slightly relaxed tolerance.
    assert jnp.allclose(out, ref, atol=2e-2, rtol=2e-2)

    print("KERNEL_OK")
</pallas_src>

<mosaic_0001>
module attributes {stable_mosaic.version = 11 : i64} {
  func.func @_mul_conv1x1_kernel(%arg0: i32, %arg1: memref<128x2064xbf16, #tpu.memory_space<vmem>>, %arg2: memref<1x2064xbf16, #tpu.memory_space<vmem>>, %arg3: memref<2064x49xbf16, #tpu.memory_space<vmem>>, %arg4: memref<128x49xf32, #tpu.memory_space<vmem>>) attributes {dimension_semantics = [#tpu.dimension_semantics<parallel>], iteration_bounds = array<i64: 3>, scalar_prefetch = 0 : i64, scratch_operands = 0 : i64, tpu.core_type = #tpu.core_type<tc>, window_params = [{transform_indices = @transform_0, window_bounds = array<i64: 128, 2064>}, {pipeline_mode = #tpu.pipeline_mode<synchronous>, transform_indices = @transform_1, window_bounds = array<i64: 1, 2064>}, {pipeline_mode = #tpu.pipeline_mode<synchronous>, transform_indices = @transform_2, window_bounds = array<i64: 2064, 49>}, {transform_indices = @transform_3, window_bounds = array<i64: 128, 49>}]} {
    %c0 = arith.constant 0 : index
    %c0_0 = arith.constant 0 : index
    %0 = vector.load %arg1[%c0, %c0_0] : memref<128x2064xbf16, #tpu.memory_space<vmem>>, vector<128x2064xbf16>
    %c0_1 = arith.constant 0 : index
    %c0_2 = arith.constant 0 : index
    %1 = vector.load %arg2[%c0_1, %c0_2] : memref<1x2064xbf16, #tpu.memory_space<vmem>>, vector<1x2064xbf16>
    %2 = vector.broadcast %1 : vector<1x2064xbf16> to vector<128x2064xbf16>
    %3 = arith.mulf %0, %2 : vector<128x2064xbf16>
    %c0_3 = arith.constant 0 : index
    %c0_4 = arith.constant 0 : index
    %4 = vector.load %arg3[%c0_3, %c0_4] : memref<2064x49xbf16, #tpu.memory_space<vmem>>, vector<2064x49xbf16>
    %cst = arith.constant dense<0.000000e+00> : vector<128x49xf32>
    %5 = tpu.matmul %3, %4, %cst {dimension_numbers = #tpu.dot_dimension_numbers<[1], [0], [0], [1], [0, 0, 1, 1], [], []>} : vector<128x2064xbf16>, vector<2064x49xbf16>, vector<128x49xf32> -> vector<128x49xf32>
    %c0_5 = arith.constant 0 : index
    %c0_6 = arith.constant 0 : index
    %6 = vector.load %arg4[%c0_5, %c0_6] : memref<128x49xf32, #tpu.memory_space<vmem>>, vector<128x49xf32>
    tpu.vector_store %arg4[%c0_5, %c0_6], %5 {strides = array<i32>} : memref<128x49xf32, #tpu.memory_space<vmem>>, vector<128x49xf32>,
    return
  }
  func.func @transform_0(%arg0: i32) -> (i32, i32) {
    %c0_i32 = arith.constant 0 : i32
    %c0_i32_0 = arith.constant 0 : i32
    return %arg0, %c0_i32 : i32, i32
  }
  func.func @transform_1(%arg0: i32) -> (i32, i32) {
    %c0_i32 = arith.constant 0 : i32
    %c0_i32_0 = arith.constant 0 : i32
    %c0_i32_1 = arith.constant 0 : i32
    return %c0_i32, %c0_i32_0 : i32, i32
  }
  func.func @transform_2(%arg0: i32) -> (i32, i32) {
    %c0_i32 = arith.constant 0 : i32
    %c0_i32_0 = arith.constant 0 : i32
    %c0_i32_1 = arith.constant 0 : i32
    return %c0_i32, %c0_i32_0 : i32, i32
  }
  func.func @transform_3(%arg0: i32) -> (i32, i32) {
    %c0_i32 = arith.constant 0 : i32
    %c0_i32_0 = arith.constant 0 : i32
    return %arg0, %c0_i32 : i32, i32
  }
}

</mosaic_0001>

<bundles_post_ra>
// kernel: mul_conv2d_1x1.1
= control target key start
LH: loop header
LB: loop body
LE: loop exit
PB: predicated region body
PF: predicated region fallthrough
CT: control target
= control target key end

     0   :  { %s4861_s12 = smov 0   ;;  %s4863_s13 = smov 0   ;;  %s5988_s0 = inlined_call_operand.vmem [shape: bf16[344,2064], index: 0, kind: input, shape index: {}]   ;;  %s5989_s1 = inlined_call_operand.vmem [shape: bf16[1,2064], index: 1, kind: input, shape index: {}]   ;;  %s5990_s2 = inlined_call_operand.vmem [shape: bf16[2064,49], index: 2, kind: input, shape index: {}]   ;;  %s5991_s3 = inlined_call_operand.vmem [shape: f32[344,49], index: 3, kind: output, shape index: {}]  }
   0x1   :  { %s4865_s14 = smov 0  }
   0x2 LB: > { %s4874_s15 = sadd.s32 4294967295, %s4806_s14   ;;  %s4876_s16 = sadd.s32 1, %s4806_s14   ;;  %s4806_s14 = sphi %s4865_s14, %s5998_s14   ;;  %s4802_s13 = sphi %s4863_s13, %s5997_s13   ;;  %s4798_s12 = sphi %s4861_s12, %s5996_s12  }
   0x3   : > { %s85_s17 = ssub.s32 %s4806_s14, %s4876_s16  ;;  %s88_s18 = sadd.s32 1, %s4802_s13 }
   0x4   : > { %p86_p0 = scmp.eq.s32.totalorder %s85_s17, 0  ;;  %p98_p1 = scmp.ne.s32.totalorder %s4802_s13, %s4798_s12 }
   0x5   : > { %p99_p2 = scmp.eq.s32.totalorder %s4874_s15, 2  ;;  %p3683_p3 = scmp.ge.s32.totalorder %s4806_s14, 1 }
   0x6   : > { %s4884_s19 = scalar_select %p86_p0, %s4802_s13, %s88_s18  }
   0x7   : > { %p4886_p4 = por %p99_p2, %p98_p1  ;;  %p149_p5 = scmp.lt.s32.totalorder %s4806_s14, 4 }
   0x9   : > { %p150_p6 = pnand %p3683_p3, %p149_p5 }
   0xa   : > { %v4621_v0 = vld [vmem:[%s5990_s2 + $0x40] sm:$0xff] (!%p150_p6)   ;;  %v4625_v4 = vld [vmem:[%s5990_s2 + $0x48] sm:$0xff] (!%p150_p6)   ;;  %v4629_v8 = vld [vmem:[%s5990_s2 + $0x50] sm:$0xff] (!%p150_p6)   ;;  %s4981_s14 = sshll.u32 (!%p150_p6), %s4874_s15, 4  ;;  %v355_v30 = vlaneseq (!%p150_p6)  ;;  %v4840_v33 = vmov (!%p150_p6), 1966171168  }
   0xb   : > { %153 = sbr.rel (%p150_p6) target bundleno = 577 (0x241), region = 32  ;;  %v4622_v1 = vld [vmem:[%s5990_s2 + $0xc0] sm:$0xff] (!%p150_p6)   ;;  %3990 = vmatprep.subr.bf16.mxu0 (!%p150_p6), %v4621_v0  ;;  %v4626_v5 = vld [vmem:[%s5990_s2 + $0xc8] sm:$0xff] (!%p150_p6)   ;;  %v4630_v9 = vld [vmem:[%s5990_s2 + $0xd0] sm:$0xff] (!%p150_p6)   ;;  %p184_p7 = scmp.lt.s32.totalorder (!%p150_p6), %s4981_s14, 42  ;;  %v353_v34 = vunpack.c.l.s4 (!%p150_p6), %v4840_v33  ;;  %vm2490_vm0 = vcmask (!%p150_p6), 130048  }
   0xc   : > { %v4623_v2 = vld [vmem:[%s5990_s2] sm:$0xff] (!%p150_p6)   ;;  %4054 = vmatprep.subr.bf16.mxu1 (!%p150_p6), %v4622_v1  ;;  %v4627_v6 = vld [vmem:[%s5990_s2 + $0x8] sm:$0xff] (!%p150_p6)   ;;  %v4631_v10 = vld [vmem:[%s5990_s2 + $0x10] sm:$0xff] (!%p150_p6)   ;;  %v356_v35 = vshrl.u32 (!%p150_p6), %v355_v30, 7  ;;  %vm3388_vm1 = vcmask (!%p150_p6), 400384  }
   0xd   : > { %v4624_v3 = vld [vmem:[%s5990_s2 + $0x80] sm:$0xff] (!%p150_p6)   ;;  %3991 = vmatpush3.bf16.msra.mxu0 (!%p150_p6), %v4623_v2  ;;  %v4628_v7 = vld [vmem:[%s5990_s2 + $0x88] sm:$0xff] (!%p150_p6)   ;;  %v4632_v11 = vld [vmem:[%s5990_s2 + $0x90] sm:$0xff] (!%p150_p6)   ;;  %v354_v37 = vunpack.c.0.s8 (!%p150_p6), %v353_v34 }
   0xe   : > { %4055 = vmatpush3.bf16.msra.mxu1 (!%p150_p6), %v4624_v3  ;;  %3992 = vmatprep.subr.bf16.mxu0 (!%p150_p6), %v4625_v4  ;;  %v4633_v12 = vld [vmem:[%s5990_s2 + $0x58] sm:$0xff] (!%p150_p6)   ;;  %v4637_v16 = vld [vmem:[%s5990_s2 + $0x60] sm:$0xff] (!%p150_p6)   ;;  %v4641_v20 = vld [vmem:[%s5990_s2 + $0x68] sm:$0xff] (!%p150_p6)   ;;  %v5007_v44 = vsub.s32 (!%p150_p6), 0, %v356_v35 }
   0xf   : > { %4056 = vmatprep.subr.bf16.mxu1 (!%p150_p6), %v4626_v5  ;;  %v4634_v13 = vld [vmem:[%s5990_s2 + $0xd8] sm:$0xff] (!%p150_p6)   ;;  %v4638_v17 = vld [vmem:[%s5990_s2 + $0xe0] sm:$0xff] (!%p150_p6)   ;;  %v4642_v21 = vld [vmem:[%s5990_s2 + $0xe8] sm:$0xff] (!%p150_p6)   ;;  %v5002_v40 = vsub.s32 (!%p150_p6), %v354_v37, %v356_v35 }
  0x10   : > { %v4635_v14 = vld [vmem:[%s5990_s2 + $0x18] sm:$0xff] (!%p150_p6)   ;;  %v4639_v18 = vld [vmem:[%s5990_s2 + $0x20] sm:$0xff] (!%p150_p6)   ;;  %v4643_v22 = vld [vmem:[%s5990_s2 + $0x28] sm:$0xff] (!%p150_p6)  }
  0x11   : > { %3993 = vmatpush3.bf16.msra.mxu0 (!%p150_p6), %v4627_v6  ;;  %v4636_v15 = vld [vmem:[%s5990_s2 + $0x98] sm:$0xff] (!%p150_p6)   ;;  %v4640_v19 = vld [vmem:[%s5990_s2 + $0xa0] sm:$0xff] (!%p150_p6)   ;;  %v4644_v23 = vld [vmem:[%s5990_s2 + $0xa8] sm:$0xff] (!%p150_p6)  }
  0x12   : > { %4057 = vmatpush3.bf16.msra.mxu1 %v4628_v7  ;;  %3994 = vmatprep.subr.bf16.mxu0 %v4629_v8  ;;  %v4645_v24 = vld [vmem:[%s5990_s2 + $0x70] sm:$0xff]   ;;  %v4649_v28 = vld [vmem:[%s5990_s2 + $0x78] sm:$0xff]   ;;  %v4654_v36 = vld [vmem:[%s5990_s2 + $0x140] sm:$0xff]   ;;  %s185_s27 = scalar_select %p184_p7, %s4981_s14, 42 }
  0x13   : > { %4058 = vmatprep.subr.bf16.mxu1 %v4630_v9  ;;  %v4646_v25 = vld [vmem:[%s5990_s2 + $0xf0] sm:$0xff]   ;;  %v4650_v29 = vld [vmem:[%s5990_s2 + $0xf8] sm:$0xff]   ;;  %v4655_v38 = vld [vmem:[%s5990_s2 + $0x1c0] sm:$0xff]   ;;  %s3413_s17 = ssub.s32 (%p4886_p4), 43, %s4981_s14  ;;  %s3987_s18 = sshll.u32 (%p4886_p4), %s4874_s15, 7 }
  0x14   : > { %v4647_v26 = vld [vmem:[%s5990_s2 + $0x30] sm:$0xff]   ;;  %v4651_v31 = vld [vmem:[%s5990_s2 + $0x38] sm:$0xff]   ;;  %v5000_v39 = vld [vmem:[%s5989_s1] sm:$0xff]  ;;  %s4531_s30 = smul.u32 68, %s185_s27  ;;  %p3414_p8 = scmp.lt.s32.totalorder (%p4886_p4), %s3413_s17, 16 }
  0x15   : > { %3995 = vmatpush3.bf16.msra.mxu0 %v4631_v10  ;;  %v4648_v27 = vld [vmem:[%s5990_s2 + $0xb0] sm:$0xff]   ;;  %v4652_v32 = vld [vmem:[%s5990_s2 + $0xb8] sm:$0xff]   ;;  %v358_v41 = vrot.slane %v5000_v39, %v5002_v40  ;;  %v4656_v10 = vld [vmem:[%s5990_s2 + $0x100] sm:$0xff]   ;;  %s5895_s23 = scalar_lea.vmem (%p4886_p4), %s5991_s3, %s3987_s18  }
  0x16   : > { %4059 = vmatpush3.bf16.msra.mxu1 %v4632_v11  ;;  %3996 = vmatprep.subr.bf16.mxu0 %v4633_v12  ;;  %s5013_s6 = scalar_lea.vmem %s5988_s0, %s4531_s30  ;;  %v4657_v11 = vld [vmem:[%s5990_s2 + $0x180] sm:$0xff]  }
  0x17   : > { %4060 = vmatprep.subr.bf16.mxu1 %v4634_v13  ;;  %v366_v42 = vcombine.high %v358_v41, %v358_v41  ;;  %v374_v43 = vrot.slane %v358_v41, %v5002_v40  ;;  %v201_v52 = vld [vmem:[%s5013_s6] sm:$0xff]  ;;  %v202_v57 = vld [vmem:[%s5013_s6 + $0x8] sm:$0xff]  ;;  %v220_v63 = vld [vmem:[%s5013_s6 + $0x90] sm:$0xff] }
  0x18   : > { %v210_v56 = vld [vmem:[%s5013_s6 + $0x44] sm:$0xff]  ;;  %v211_v60 = vld [vmem:[%s5013_s6 + $0x4c] sm:$0xff]  ;;  %v229_v4 = vld [vmem:[%s5013_s6 + $0xd4] sm:$0xff] }
  0x19   : > { %3997 = vmatpush3.bf16.msra.mxu0 %v4635_v14  ;;  %v388_v45 = vrot.slane %v366_v42, %v5002_v40  ;;  %v464_v46 = vpack.i.b16 %v374_v43, %v374_v43  ;;  %v396_v47 = vcombine.high %v374_v43, %v374_v43  ;;  %v219_v58 = vld [vmem:[%s5013_s6 + $0x88] sm:$0xff]  ;;  %v255_v34 = vld [vmem:[%s5013_s6 + $0x198] sm:$0xff]  ;;  %v4665_v42 = vld [vmem:[%s5990_s2 + $0x190] sm:$0xff]  }
  0x1a   : > { %4061 = vmatpush3.bf16.msra.mxu1 %v4636_v15  ;;  %3998 = vmatprep.subr.bf16.mxu0 %v4637_v16  ;;  %v228_v62 = vld [vmem:[%s5013_s6 + $0xcc] sm:$0xff]  ;;  %v256_v43 = vld [vmem:[%s5013_s6 + $0x1a0] sm:$0xff] }
  0x1b   : > { %4062 = vmatprep.subr.bf16.mxu1 %v4638_v17  ;;  %v469_v48 = vrot.slane %v464_v46, %v5007_v44  ;;  %v471_v49 = vpack.i.b16 %v388_v45, %v388_v45  ;;  %v398_v50 = vcombine.high %v388_v45, %v388_v45  ;;  %v478_v51 = vpack.i.b16 %v396_v47, %v396_v47  ;;  %v4658_v15 = vld [vmem:[%s5990_s2 + $0x148] sm:$0xff]   ;;  %v237_v17 = vld [vmem:[%s5013_s6 + $0x110] sm:$0xff]  ;;  %v4667_v46 = vld [vmem:[%s5990_s2 + $0x1d8] sm:$0xff]  }
  0x1c   : > { %v4659_v16 = vld [vmem:[%s5990_s2 + $0x1c8] sm:$0xff]  }
  0x1d   : > { %3999 = vmatpush3.bf16.msra.mxu0 %v4639_v18  ;;  %v476_v53 = vrot.slane %v471_v49, %v5007_v44  ;;  %v483_v54 = vrot.slane %v478_v51, %v5007_v44  ;;  %v485_v55 = vpack.i.b16 %v398_v50, %v398_v50  ;;  %v246_v18 = vld [vmem:[%s5013_s6 + $0x154] sm:$0xff]  ;;  %v265_v45 = vld [vmem:[%s5013_s6 + $0x1e4] sm:$0xff] }
  0x1e   : > { %4063 = vmatpush3.bf16.msra.mxu1 %v4640_v19  ;;  %4000 = vmatprep.subr.bf16.mxu0 %v4641_v20  ;;  %v4668_v49 = vld [vmem:[%s5990_s2 + $0x118] sm:$0xff]   ;;  %v4670_v50 = vld [vmem:[%s5990_s2 + $0x160] sm:$0xff]  }
  0x1f   : > { %4064 = vmatprep.subr.bf16.mxu1 %v4642_v21  ;;  %v5022_v59 = vcombine.low %v469_v48, %v476_v53  ;;  %v490_v61 = vrot.slane %v485_v55, %v5007_v44  ;;  %v238_v21 = vld [vmem:[%s5013_s6 + $0x118] sm:$0xff]  ;;  %v273_v55 = vld [vmem:[%s5013_s6 + $0x220] sm:$0xff] }
  0x20   : > { %v4669_v53 = vld [vmem:[%s5990_s2 + $0x198] sm:$0xff]  }
  0x21   : > { %4001 = vmatpush3.bf16.msra.mxu0 %v4643_v22  ;;  %v634_v0 = vmul.bf16 %v5022_v59, %v201_v52  ;;  %v643_v1 = vmul.bf16 %v5022_v59, %v210_v56  ;;  %v5030_v2 = vcombine.low %v483_v54, %v490_v61  ;;  %v652_v3 = vmul.bf16 %v5022_v59, %v219_v58  ;;  %v4671_v56 = vld [vmem:[%s5990_s2 + $0x1e0] sm:$0xff]  }
  0x22   : > { %4065 = vmatpush3.bf16.msra.mxu1 %v4644_v23  ;;  %4002 = vmatprep.subr.bf16.mxu0 %v4645_v24  ;;  %v661_v5 = vmul.bf16 %v5022_v59, %v228_v62  ;;  %v247_v23 = vld [vmem:[%s5013_s6 + $0x15c] sm:$0xff]  ;;  %v4660_v24 = vld [vmem:[%s5990_s2 + $0x108] sm:$0xff]   ;;  %v688_v47 = vmul.bf16 %v5022_v59, %v255_v34 }
  0x23   : > { %4066 = vmatprep.subr.bf16.mxu1 %v4646_v25  ;;  %v3698_v6 = vcombine.high %v634_v0, %v643_v1  ;;  %v635_v7 = vmul.bf16 %v5030_v2, %v202_v57  ;;  %v644_v8 = vmul.bf16 %v5030_v2, %v211_v60  ;;  %v3697_v9 = vcombine.low %v634_v0, %v643_v1  ;;  %v282_v58 = vld [vmem:[%s5013_s6 + $0x264] sm:$0xff] }
  0x24   : > { %v3715_v12 = vcombine.high %v652_v3, %v661_v5  ;;  %v653_v13 = vmul.bf16 %v5030_v2, %v220_v63  ;;  %v662_v14 = vmul.bf16 %v5030_v2, %v229_v4  ;;  %v670_v25 = vmul.bf16 %v5022_v59, %v237_v17  ;;  %v4672_v60 = vld [vmem:[%s5990_s2 + $0x120] sm:$0xff]   ;;  %v274_v62 = vld [vmem:[%s5013_s6 + $0x228] sm:$0xff]  ;;  %v4680_v17 = vld [vmem:[%s5990_s2 + $0x130] sm:$0xff]  }
  0x25   : > { %4003 = vmatpush3.bf16.msra.mxu0 %v4647_v26  ;;  %2547 = vmatprep.mubr.bf16.mxu0 %v3698_v6  ;;  %v3700_v19 = vcombine.high %v635_v7, %v644_v8  ;;  %v3699_v20 = vcombine.low %v635_v7, %v644_v8  ;;  %v679_v26 = vmul.bf16 %v5022_v59, %v246_v18  ;;  %v283_v63 = vld [vmem:[%s5013_s6 + $0x26c] sm:$0xff] }
  0x26   : > { %4067 = vmatpush3.bf16.msra.mxu1 %v4648_v27  ;;  %4004 = vmatprep.subr.bf16.mxu0 %v4649_v28  ;;  %v3717_v22 = vcombine.high %v653_v13, %v662_v14  ;;  %v4662_v27 = vld [vmem:[%s5990_s2 + $0x150] sm:$0xff]   ;;  %v4661_v28 = vld [vmem:[%s5990_s2 + $0x188] sm:$0xff]   ;;  %v680_v30 = vmul.bf16 %v5030_v2, %v247_v23  ;;  %v3714_v33 = vcombine.low %v652_v3, %v661_v5  ;;  %v4673_v3 = vld [vmem:[%s5990_s2 + $0x1a0] sm:$0xff]  }
  0x27   : > { %4068 = vmatprep.subr.bf16.mxu1 %v4650_v29  ;;  %2644 = vmatprep.mubr.bf16.mxu1 %v3700_v19  ;;  %v671_v29 = vmul.bf16 %v5030_v2, %v238_v21  ;;  %v3732_v35 = vcombine.high %v670_v25, %v679_v26  ;;  %v3716_v37 = vcombine.low %v653_v13, %v662_v14  ;;  %v4674_v0 = vld [vmem:[%s5990_s2 + $0x168] sm:$0xff]   ;;  %v4678_v8 = vld [vmem:[%s5990_s2 + $0x170] sm:$0xff]   ;;  %v4682_v19 = vld [vmem:[%s5990_s2 + $0x178] sm:$0xff]  }
  0x28   : > { %v689_v51 = vmul.bf16 %v5030_v2, %v256_v43  ;;  %v698_v52 = vmul.bf16 %v5030_v2, %v265_v45  ;;  %v3731_v54 = vcombine.low %v670_v25, %v679_v26  ;;  %v4675_v4 = vld [vmem:[%s5990_s2 + $0x1e8] sm:$0xff]   ;;  %v706_v5 = vmul.bf16 %v5022_v59, %v273_v55  ;;  %v4681_v21 = vld [vmem:[%s5990_s2 + $0x1b0] sm:$0xff]   ;;  %v4683_v25 = vld [vmem:[%s5990_s2 + $0x1f8] sm:$0xff]  }
  0x29   : > { %4005 = vmatpush3.bf16.msra.mxu0 %v4651_v31  ;;  %v4663_v31 = vld [vmem:[%s5990_s2 + $0x1d0] sm:$0xff]   ;;  %v3734_v41 = vcombine.high %v671_v29, %v680_v30  ;;  %v3733_v61 = vcombine.low %v671_v29, %v680_v30  ;;  %v715_v6 = vmul.bf16 %v5022_v59, %v282_v58  ;;  %v4676_v7 = vld [vmem:[%s5990_s2 + $0x128] sm:$0xff]   ;;  %v4686_v29 = vld [vmem:[%s5990_s2 + $0x240] sm:$0xff]  }
  0x2a   : > { %4069 = vmatpush3.bf16.msra.mxu1 %v4652_v32  ;;  %4118 = vmatprep.subr.bf16.mxu0 %v4654_v36  ;;  %v4664_v32 = vld [vmem:[%s5990_s2 + $0x110] sm:$0xff]   ;;  %v264_v36 = vld [vmem:[%s5013_s6 + $0x1dc] sm:$0xff]  ;;  %v3751_v1 = vcombine.high %v689_v51, %v698_v52  ;;  %v291_v14 = vld [vmem:[%s5013_s6 + $0x2a8] sm:$0xff]  ;;  %v3750_v18 = vcombine.low %v689_v51, %v698_v52 }
  0x2b   : > { %4182 = vmatprep.subr.bf16.mxu1 %v4655_v38  ;;  %v4666_v38 = vld [vmem:[%s5990_s2 + $0x158] sm:$0xff]   ;;  %v697_v48 = vmul.bf16 %v5022_v59, %v264_v36  ;;  %v292_v23 = vld [vmem:[%s5013_s6 + $0x2b0] sm:$0xff]  ;;  %v724_v26 = vmul.bf16 %v5022_v59, %v291_v14  ;;  %v3765_v34 = vcombine.low %v706_v5, %v715_v6 }
  0x2c   : > { %2548 = vmatmul.mubr.bf16.vlgmr.msra.gmra.mrb[0].mxu0 %v3697_v9  ;;  %v351_v9 = vcombine.high %v5000_v39, %v5000_v39  ;;  %v4679_v39 = vld [vmem:[%s5990_s2 + $0x1f0] sm:$0xff]   ;;  %v725_v30 = vmul.bf16 %v5030_v2, %v292_v23  ;;  %v310_v43 = vld [vmem:[%s5013_s6 + $0x338] sm:$0xff] }
  0x2d   : > { %4119 = vmatpush3.bf16.msra.mxu0 %v4656_v10  ;;  %2645 = vmatmul.mubr.bf16.vlgmr.msra.gmra.mrb[0].mxu1 %v3699_v20  ;;  %v3749_v57 = vcombine.high %v688_v47, %v697_v48  ;;  %v707_v10 = vmul.bf16 %v5030_v2, %v274_v62  ;;  %v3748_v13 = vcombine.low %v688_v47, %v697_v48  ;;  %v319_v47 = vld [vmem:[%s5013_s6 + $0x37c] sm:$0xff] }
  0x2e   : > { %2555 = vmatprep.mubr.bf16.mxu0 %v3715_v12  ;;  %4183 = vmatpush3.bf16.msra.mxu1 %v4657_v11  ;;  %v716_v11 = vmul.bf16 %v5030_v2, %v283_v63  ;;  %v4677_v12 = vld [vmem:[%s5990_s2 + $0x1a8] sm:$0xff]   ;;  %v752_v51 = vmul.bf16 %v5030_v2, %v319_v47 }
  0x2f   : > { %2652 = vmatprep.mubr.bf16.mxu1 %v3717_v22  ;;  %4120 = vmatprep.subr.bf16.mxu0 %v4658_v15  ;;  %v300_v15 = vld [vmem:[%s5013_s6 + $0x2ec] sm:$0xff]  ;;  %v365_v22 = vrot.slane %v351_v9, %v5002_v40 }
  0x30   : > { %4184 = vmatprep.subr.bf16.mxu1 %v4659_v16  ;;  %v3766_v16 = vcombine.high %v706_v5, %v715_v6  ;;  %v3768_v20 = vcombine.high %v707_v10, %v716_v11 }
  0x31   : > { %4121 = vmatpush3.bf16.msra.mxu0 %v4660_v24  ;;  %v301_v24 = vld [vmem:[%s5013_s6 + $0x2f4] sm:$0xff]  ;;  %v381_v45 = vrot.slane %v365_v22, %v5002_v40 }
  0x32   : > { %4122 = vmatprep.subr.bf16.mxu0 %v4662_v27  ;;  %4185 = vmatpush3.bf16.msra.mxu1 %v4661_v28  ;;  %v733_v27 = vmul.bf16 %v5022_v59, %v300_v15  ;;  %v4684_v28 = vld [vmem:[%s5990_s2 + $0x138] sm:$0xff]   ;;  %v203_v15 = vld [vmem:[%s5013_s6 + $0x10] sm:$0xff] }
  0x33   : > { %4186 = vmatprep.subr.bf16.mxu1 %v4663_v31  ;;  %v734_v31 = vmul.bf16 %v5030_v2, %v301_v24  ;;  %v397_v52 = vcombine.high %v381_v45, %v381_v45 }
  0x34   : > { %2556 = vmatmul.mubr.bf16.gmra.mrb[4].mxu0 %v3714_v33  ;;  %v367_v33 = vcombine.high %v365_v22, %v365_v22  ;;  %v3783_v36 = vcombine.high %v724_v26, %v733_v27 }
  0x35   : > { %2563 = vmatprep.mubr.bf16.mxu0 %v3732_v35  ;;  %4123 = vmatpush3.bf16.msra.mxu0 %v4664_v32  ;;  %v4685_v32 = vld [vmem:[%s5990_s2 + $0x1b8] sm:$0xff]   ;;  %v4687_v35 = vld [vmem:[%s5990_s2 + $0x2c0] sm:$0xff]   ;;  %v506_v63 = vpack.i.b16 %v397_v52, %v397_v52 }
  0x36   : > { %2653 = vmatmul.mubr.bf16.gmra.mrb[4].mxu1 %v3716_v37  ;;  %4124 = vmatprep.subr.bf16.mxu0 %v4666_v38  ;;  %v3767_v37 = vcombine.low %v707_v10, %v716_v11  ;;  %v309_v38 = vld [vmem:[%s5013_s6 + $0x330] sm:$0xff] }
  0x37   : > { %2660 = vmatprep.mubr.bf16.mxu1 %v3734_v41  ;;  %4187 = vmatpush3.bf16.msra.mxu1 %v4665_v42  ;;  %v318_v41 = vld [vmem:[%s5013_s6 + $0x374] sm:$0xff]  ;;  %v3785_v42 = vcombine.high %v725_v30, %v734_v31  ;;  %v742_v48 = vmul.bf16 %v5022_v59, %v309_v38  ;;  %v511_v10 = vrot.slane %v506_v63, %v5007_v44 }
  0x38   : > { %4188 = vmatprep.subr.bf16.mxu1 %v4667_v46  ;;  %v395_v46 = vrot.slane %v367_v33, %v5002_v40  ;;  %v4697_v63 = vld [vmem:[%s5990_s2 + $0x290] sm:$0xff]  }
  0x39   : > { %4125 = vmatpush3.bf16.msra.mxu0 %v4668_v49  ;;  %v751_v49 = vmul.bf16 %v5022_v59, %v318_v41  ;;  %v4690_v41 = vld [vmem:[%s5990_s2 + $0x248] sm:$0xff]  }
  0x3a   : > { %4126 = vmatprep.subr.bf16.mxu0 %v4670_v50  ;;  %v743_v50 = vmul.bf16 %v5030_v2, %v310_v43  ;;  %v499_v58 = vpack.i.b16 %v395_v46, %v395_v46  ;;  %v4691_v43 = vld [vmem:[%s5990_s2 + $0x2c8] sm:$0xff]  }
  0x3b   : > { %4189 = vmatpush3.bf16.msra.mxu1 %v4669_v53  ;;  %v399_v53 = vcombine.high %v395_v46, %v395_v46  ;;  %v3800_v55 = vcombine.high %v742_v48, %v751_v49  ;;  %v248_v46 = vld [vmem:[%s5013_s6 + $0x164] sm:$0xff] }
  0x3c   : > { %2564 = vmatmul.mubr.bf16.gmra.mrb[8].mxu0 %v3731_v54  ;;  %4190 = vmatprep.subr.bf16.mxu1 %v4671_v56  ;;  %v3782_v54 = vcombine.low %v724_v26, %v733_v27  ;;  %v327_v56 = vld [vmem:[%s5013_s6 + $0x3b8] sm:$0xff]  ;;  %v3802_v62 = vcombine.high %v743_v50, %v752_v51 }
  0x3d   : > { %2571 = vmatprep.mubr.bf16.mxu0 %v3749_v57  ;;  %4127 = vmatpush3.bf16.msra.mxu0 %v4672_v60  ;;  %v492_v57 = vpack.i.b16 %v381_v45, %v381_v45  ;;  %v3784_v60 = vcombine.low %v725_v30, %v734_v31  ;;  %v230_v27 = vld [vmem:[%s5013_s6 + $0xdc] sm:$0xff]  ;;  %v231_v30 = vld [vmem:[%s5013_s6 + $0xe4] sm:$0xff] }
  0x3e   : > { %2661 = vmatmul.mubr.bf16.gmra.mrb[8].mxu1 %v3733_v61  ;;  %4128 = vmatprep.subr.bf16.mxu0 %v4674_v0  ;;  %v336_v61 = vld [vmem:[%s5013_s6 + $0x3fc] sm:$0xff]  ;;  %v513_v0 = vpack.i.b16 %v399_v53, %v399_v53  ;;  %v4694_v53 = vld [vmem:[%s5990_s2 + $0x250] sm:$0xff]  }
  0x3f   : > { %2668 = vmatprep.mubr.bf16.mxu1 %v3751_v1  ;;  %4191 = vmatpush3.bf16.msra.mxu1 %v4673_v3  ;;  %v328_v1 = vld [vmem:[%s5013_s6 + $0x3c0] sm:$0xff]  ;;  %v769_v5 = vmul.bf16 %v5022_v59, %v336_v61  ;;  %v497_v6 = vrot.slane %v492_v57, %v5007_v44  ;;  %v4695_v57 = vld [vmem:[%s5990_s2 + $0x2d0] sm:$0xff]   ;;  %v257_v61 = vld [vmem:[%s5013_s6 + $0x1a8] sm:$0xff] }
  0x40   : > { %4192 = vmatprep.subr.bf16.mxu1 %v4675_v4  ;;  %v337_v3 = vld [vmem:[%s5013_s6 + $0x404] sm:$0xff]  ;;  %v760_v4 = vmul.bf16 %v5022_v59, %v327_v56  ;;  %v518_v11 = vrot.slane %v513_v0, %v5007_v44  ;;  %v3801_v59 = vcombine.low %v743_v50, %v752_v51  ;;  %v266_v0 = vld [vmem:[%s5013_s6 + $0x1ec] sm:$0xff] }
  0x41   : > { %4129 = vmatpush3.bf16.msra.mxu0 %v4676_v7  ;;  %v504_v7 = vrot.slane %v499_v58, %v5007_v44  ;;  %v770_v9 = vmul.bf16 %v5030_v2, %v337_v3  ;;  %v239_v45 = vld [vmem:[%s5013_s6 + $0x120] sm:$0xff]  ;;  %v4692_v50 = vld [vmem:[%s5990_s2 + $0x208] sm:$0xff]   ;;  %v4698_v3 = vld [vmem:[%s5990_s2 + $0x258] sm:$0xff]  }
  0x42   : > { %4130 = vmatprep.subr.bf16.mxu0 %v4678_v8  ;;  %v761_v8 = vmul.bf16 %v5030_v2, %v328_v1  ;;  %v213_v2 = vld [vmem:[%s5013_s6 + $0x5c] sm:$0xff]  ;;  %v3816_v23 = vcombine.low %v760_v4, %v769_v5 }
  0x43   : > { %4193 = vmatpush3.bf16.msra.mxu1 %v4677_v12  ;;  %v3799_v12 = vcombine.low %v742_v48, %v751_v49  ;;  %v5192_v14 = vcombine.low %v497_v6, %v504_v7  ;;  %v240_v48 = vld [vmem:[%s5013_s6 + $0x128] sm:$0xff]  ;;  %v267_v6 = vld [vmem:[%s5013_s6 + $0x1f4] sm:$0xff] }
  0x44   : > { %2572 = vmatmul.mubr.bf16.gmra.mrb[12].mxu0 %v3748_v13  ;;  %4194 = vmatprep.subr.bf16.mxu1 %v4679_v39  ;;  %v3817_v13 = vcombine.high %v760_v4, %v769_v5  ;;  %v212_v39 = vld [vmem:[%s5013_s6 + $0x54] sm:$0xff]  ;;  %v3818_v26 = vcombine.low %v761_v8, %v770_v9  ;;  %v249_v49 = vld [vmem:[%s5013_s6 + $0x16c] sm:$0xff] }
  0x45   : > { %2579 = vmatprep.mubr.bf16.mxu0 %v3766_v16  ;;  %4131 = vmatpush3.bf16.msra.mxu0 %v4680_v17  ;;  %v3819_v16 = vcombine.high %v761_v8, %v770_v9  ;;  %v204_v17 = vld [vmem:[%s5013_s6 + $0x18] sm:$0xff]  ;;  %v672_v51 = vmul.bf16 %v5192_v14, %v239_v45  ;;  %v681_v52 = vmul.bf16 %v5192_v14, %v248_v46  ;;  %v258_v5 = vld [vmem:[%s5013_s6 + $0x1b0] sm:$0xff]  ;;  %v294_v45 = vld [vmem:[%s5013_s6 + $0x2c0] sm:$0xff] }
  0x46   : > { %2669 = vmatmul.mubr.bf16.gmra.mrb[12].mxu1 %v3750_v18  ;;  %4132 = vmatprep.subr.bf16.mxu0 %v4682_v19  ;;  %v5197_v18 = vcombine.low %v511_v10, %v518_v11  ;;  %v636_v19 = vmul.bf16 %v5192_v14, %v203_v15  ;;  %v4699_v7 = vld [vmem:[%s5990_s2 + $0x2d8] sm:$0xff]   ;;  %v690_v8 = vmul.bf16 %v5192_v14, %v257_v61  ;;  %v4702_v11 = vld [vmem:[%s5990_s2 + $0x260] sm:$0xff]  }
  0x47   : > { %2676 = vmatprep.mubr.bf16.mxu1 %v3768_v20  ;;  %4195 = vmatpush3.bf16.msra.mxu1 %v4681_v21  ;;  %v645_v20 = vmul.bf16 %v5192_v14, %v212_v39  ;;  %v699_v9 = vmul.bf16 %v5192_v14, %v266_v0  ;;  %v4700_v10 = vld [vmem:[%s5990_s2 + $0x218] sm:$0xff]   ;;  %v3735_v15 = vcombine.low %v672_v51, %v681_v52  ;;  %v275_v39 = vld [vmem:[%s5013_s6 + $0x230] sm:$0xff] }
  0x48   : > { %4196 = vmatprep.subr.bf16.mxu1 %v4683_v25  ;;  %v637_v21 = vmul.bf16 %v5197_v18, %v204_v17  ;;  %v646_v22 = vmul.bf16 %v5197_v18, %v213_v2  ;;  %v221_v25 = vld [vmem:[%s5013_s6 + $0x98] sm:$0xff]  ;;  %v682_v56 = vmul.bf16 %v5197_v18, %v249_v49  ;;  %v4703_v17 = vld [vmem:[%s5990_s2 + $0x2e0] sm:$0xff]  }
  0x49   : > { %4133 = vmatpush3.bf16.msra.mxu0 %v4684_v28  ;;  %v3702_v24 = vcombine.high %v636_v19, %v645_v20  ;;  %v654_v31 = vmul.bf16 %v5192_v14, %v221_v25  ;;  %v3753_v2 = vcombine.high %v690_v8, %v699_v9  ;;  %v4705_v25 = vld [vmem:[%s5990_s2 + $0x2a0] sm:$0xff]   ;;  %v4714_v46 = vld [vmem:[%s5990_s2 + $0x278] sm:$0xff]  }
  0x4a   : > { %4246 = vmatprep.subr.bf16.mxu0 %v4686_v29  ;;  %v3704_v28 = vcombine.high %v637_v21, %v646_v22  ;;  %v222_v29 = vld [vmem:[%s5013_s6 + $0xa0] sm:$0xff] }
  0x4b   : > { %4197 = vmatpush3.bf16.msra.mxu1 %v4685_v32  ;;  %v663_v32 = vmul.bf16 %v5192_v14, %v230_v27  ;;  %v655_v33 = vmul.bf16 %v5197_v18, %v222_v29  ;;  %v708_v27 = vmul.bf16 %v5192_v14, %v275_v39  ;;  %v4708_v29 = vld [vmem:[%s5990_s2 + $0x228] sm:$0xff]  }
  0x4c   : > { %2580 = vmatmul.mubr.bf16.gmra.mrb[16].mxu0 %v3765_v34  ;;  %4310 = vmatprep.subr.bf16.mxu1 %v4687_v35  ;;  %v664_v34 = vmul.bf16 %v5197_v18, %v231_v30  ;;  %v3701_v35 = vcombine.low %v636_v19, %v645_v20  ;;  %v4704_v19 = vld [vmem:[%s5990_s2 + $0x220] sm:$0xff]   ;;  %v4710_v30 = vld [vmem:[%s5990_s2 + $0x270] sm:$0xff]  }
  0x4d   : > { %2587 = vmatprep.mubr.bf16.mxu0 %v3783_v36  ;;  %v4688_v36 = vld [vmem:[%s5990_s2 + $0x200] sm:$0xff]   ;;  %v3719_v38 = vcombine.high %v654_v31, %v663_v32  ;;  %v3718_v58 = vcombine.low %v654_v31, %v663_v32 }
  0x4e   : > { %2677 = vmatmul.mubr.bf16.gmra.mrb[16].mxu1 %v3767_v37  ;;  %v4689_v37 = vld [vmem:[%s5990_s2 + $0x280] sm:$0xff]   ;;  %v3721_v47 = vcombine.high %v655_v33, %v664_v34  ;;  %v3720_v1 = vcombine.low %v655_v33, %v664_v34  ;;  %v4709_v33 = vld [vmem:[%s5990_s2 + $0x2a8] sm:$0xff]   ;;  %v3752_v34 = vcombine.low %v690_v8, %v699_v9 }
  0x4f   : > { %2684 = vmatprep.mubr.bf16.mxu1 %v3785_v42  ;;  %v3703_v42 = vcombine.low %v637_v21, %v646_v22  ;;  %v276_v21 = vld [vmem:[%s5013_s6 + $0x238] sm:$0xff]  ;;  %v321_v8 = vld [vmem:[%s5013_s6 + $0x38c] sm:$0xff] }
  0x50   : > { %v285_v22 = vld [vmem:[%s5013_s6 + $0x27c] sm:$0xff]  ;;  %v709_v31 = vmul.bf16 %v5197_v18, %v276_v21 }
  0x51   : > { %v718_v32 = vmul.bf16 %v5197_v18, %v285_v22 }
  0x53   : > { %v3771_v0 = vcombine.low %v709_v31, %v718_v32 }
  0x54   : > { %2588 = vmatmul.mubr.bf16.gmra.mrb[20].mxu0 %v3782_v54  ;;  %v4693_v54 = vld [vmem:[%s5990_s2 + $0x288] sm:$0xff]  }
  0x55   : > { %2595 = vmatprep.mubr.bf16.mxu0 %v3800_v55  ;;  %v673_v55 = vmul.bf16 %v5197_v18, %v240_v48  ;;  %v4713_v48 = vld [vmem:[%s5990_s2 + $0x2b0] sm:$0xff]  }
  0x56   : > { %2685 = vmatmul.mubr.bf16.gmra.mrb[20].mxu1 %v3784_v60  ;;  %v4696_v60 = vld [vmem:[%s5990_s2 + $0x210] sm:$0xff]  }
  0x57   : > { %2692 = vmatprep.mubr.bf16.mxu1 %v3802_v62  ;;  %v3736_v62 = vcombine.high %v672_v51, %v681_v52  ;;  %v3738_v4 = vcombine.high %v673_v55, %v682_v56  ;;  %v3737_v20 = vcombine.low %v673_v55, %v682_v56  ;;  %v4715_v51 = vld [vmem:[%s5990_s2 + $0x2f8] sm:$0xff]   ;;  %v4718_v55 = vld [vmem:[%s5990_s2 + $0x340] sm:$0xff]   ;;  %v727_v56 = vmul.bf16 %v5197_v18, %v294_v45  ;;  %v206_v45 = vld [vmem:[%s5013_s6 + $0x28] sm:$0xff] }
  0x5c   : > { %2596 = vmatmul.mubr.bf16.gmra.mrb[24].mxu0 %v3799_v12  ;;  %v691_v12 = vmul.bf16 %v5197_v18, %v258_v5  ;;  %v312_v5 = vld [vmem:[%s5013_s6 + $0x348] sm:$0xff] }
  0x5d   : > { %2603 = vmatprep.mubr.bf16.mxu0 %v3817_v13  ;;  %v700_v13 = vmul.bf16 %v5197_v18, %v267_v6 }
  0x5e   : > { %2693 = vmatmul.mubr.bf16.gmra.mrb[24].mxu1 %v3801_v59  ;;  %v4701_v59 = vld [vmem:[%s5990_s2 + $0x298] sm:$0xff]  }
  0x5f   : > { %2700 = vmatprep.mubr.bf16.mxu1 %v3819_v16  ;;  %v284_v16 = vld [vmem:[%s5013_s6 + $0x274] sm:$0xff] }
  0x64   : > { %2604 = vmatmul.mubr.bf16.gmra.mrb[28].mxu0 %v3816_v23  ;;  %v4706_v23 = vld [vmem:[%s5990_s2 + $0x268] sm:$0xff]  }
  0x65   : > { %2741 = vmatprep.mubr.bf16.mxu0 %v3702_v24  ;;  %v3755_v24 = vcombine.high %v691_v12, %v700_v13 }
  0x66   : > { %2701 = vmatmul.mubr.bf16.gmra.mrb[28].mxu1 %v3818_v26  ;;  %v4707_v26 = vld [vmem:[%s5990_s2 + $0x2e8] sm:$0xff]  }
  0x67   : > { %2838 = vmatprep.mubr.bf16.mxu1 %v3704_v28  ;;  %v717_v28 = vmul.bf16 %v5192_v14, %v284_v16  ;;  %v329_v16 = vld [vmem:[%s5013_s6 + $0x3c8] sm:$0xff] }
  0x69   : > { %v3769_v61 = vcombine.low %v708_v27, %v717_v28 }
  0x6c   : > { %2742 = vmatmul.mubr.bf16.vlgmr.msra.gmra.mrb[32].mxu0 %v3701_v35  ;;  %v293_v35 = vld [vmem:[%s5013_s6 + $0x2b8] sm:$0xff] }
  0x6d   : > { %4247 = vmatpush3.bf16.msra.mxu0 %v4688_v36  ;;  %2749 = vmatprep.mubr.bf16.mxu0 %v3719_v38  ;;  %v302_v36 = vld [vmem:[%s5013_s6 + $0x2fc] sm:$0xff]  ;;  %v5313_v38 = vld [vmem:[%s5989_s1 + $0x8] sm:$0xff]  ;;  %v726_v52 = vmul.bf16 %v5192_v14, %v293_v35 }
  0x6e   : > { %2839 = vmatmul.mubr.bf16.vlgmr.msra.gmra.mrb[32].mxu1 %v3703_v42  ;;  %4248 = vmatprep.subr.bf16.mxu0 %v4690_v41  ;;  %v3770_v41 = vcombine.high %v708_v27, %v717_v28  ;;  %v4712_v42 = vld [vmem:[%s5990_s2 + $0x230] sm:$0xff]   ;;  %v407_v49 = vrot.slane %v5313_v38, %v5002_v40 }
  0x6f   : > { %4311 = vmatpush3.bf16.msra.mxu1 %v4689_v37  ;;  %2846 = vmatprep.mubr.bf16.mxu1 %v3721_v47  ;;  %v4711_v37 = vld [vmem:[%s5990_s2 + $0x2f0] sm:$0xff]   ;;  %v3772_v47 = vcombine.high %v709_v31, %v718_v32 }
  0x70   : > { %4312 = vmatprep.subr.bf16.mxu1 %v4691_v43  ;;  %v3754_v43 = vcombine.low %v691_v12, %v700_v13  ;;  %v423_v6 = vrot.slane %v407_v49, %v5002_v40  ;;  %v754_v12 = vmul.bf16 %v5197_v18, %v321_v8 }
  0x71   : > { %4249 = vmatpush3.bf16.msra.mxu0 %v4692_v50  ;;  %v303_v50 = vld [vmem:[%s5013_s6 + $0x304] sm:$0xff] }
  0x72   : > { %4250 = vmatprep.subr.bf16.mxu0 %v4694_v53  ;;  %v735_v53 = vmul.bf16 %v5192_v14, %v302_v36  ;;  %v445_v13 = vcombine.high %v423_v6, %v423_v6 }
  0x73   : > { %4313 = vmatpush3.bf16.msra.mxu1 %v4693_v54  ;;  %v4716_v54 = vld [vmem:[%s5990_s2 + $0x238] sm:$0xff]  }
  0x74   : > { %2750 = vmatmul.mubr.bf16.gmra.mrb[36].mxu0 %v3718_v58  ;;  %4314 = vmatprep.subr.bf16.mxu1 %v4695_v57  ;;  %v736_v57 = vmul.bf16 %v5197_v18, %v303_v50  ;;  %v4717_v58 = vld [vmem:[%s5990_s2 + $0x2b8] sm:$0xff]   ;;  %v534_v22 = vpack.i.b16 %v445_v13, %v445_v13 }
  0x75   : > { %2757 = vmatprep.mubr.bf16.mxu0 %v3736_v62  ;;  %4251 = vmatpush3.bf16.msra.mxu0 %v4696_v60  ;;  %v415_v60 = vcombine.high %v407_v49, %v407_v49  ;;  %v4719_v62 = vld [vmem:[%s5990_s2 + $0x3c0] sm:$0xff]  }
  0x76   : > { %2847 = vmatmul.mubr.bf16.gmra.mrb[36].mxu1 %v3720_v1  ;;  %4252 = vmatprep.subr.bf16.mxu0 %v4698_v3  ;;  %v311_v1 = vld [vmem:[%s5013_s6 + $0x340] sm:$0xff]  ;;  %v539_v32 = vrot.slane %v534_v22, %v5007_v44 }
  0x77   : > { %2854 = vmatprep.mubr.bf16.mxu1 %v3738_v4  ;;  %4315 = vmatpush3.bf16.msra.mxu1 %v4697_v63  ;;  %v3787_v63 = vcombine.high %v726_v52, %v735_v53  ;;  %v320_v3 = vld [vmem:[%s5013_s6 + $0x384] sm:$0xff]  ;;  %v3789_v4 = vcombine.high %v727_v56, %v736_v57  ;;  %v744_v9 = vmul.bf16 %v5192_v14, %v311_v1 }
  0x78   : > { %4316 = vmatprep.subr.bf16.mxu1 %v4699_v7  ;;  %v437_v7 = vrot.slane %v415_v60, %v5002_v40 }
  0x79   : > { %4253 = vmatpush3.bf16.msra.mxu0 %v4700_v10  ;;  %v753_v10 = vmul.bf16 %v5192_v14, %v320_v3 }
  0x7a   : > { %4254 = vmatprep.subr.bf16.mxu0 %v4702_v11  ;;  %v745_v11 = vmul.bf16 %v5197_v18, %v312_v5  ;;  %v241_v5 = vld [vmem:[%s5013_s6 + $0x130] sm:$0xff] }
  0x7b   : > { %4317 = vmatpush3.bf16.msra.mxu1 %v4701_v59  ;;  %v447_v59 = vcombine.high %v437_v7, %v437_v7  ;;  %v3804_v39 = vcombine.high %v744_v9, %v753_v10 }
  0x7c   : > { %2758 = vmatmul.mubr.bf16.gmra.mrb[40].mxu0 %v3735_v15  ;;  %4318 = vmatprep.subr.bf16.mxu1 %v4703_v17  ;;  %v3786_v15 = vcombine.low %v726_v52, %v735_v53  ;;  %v520_v17 = vpack.i.b16 %v423_v6, %v423_v6  ;;  %v3806_v21 = vcombine.high %v745_v11, %v754_v12  ;;  %v223_v53 = vld [vmem:[%s5013_s6 + $0xa8] sm:$0xff]  ;;  %v250_v6 = vld [vmem:[%s5013_s6 + $0x174] sm:$0xff] }
  0x7d   : > { %2765 = vmatprep.mubr.bf16.mxu0 %v3753_v2  ;;  %4255 = vmatpush3.bf16.msra.mxu0 %v4704_v19  ;;  %v527_v2 = vpack.i.b16 %v437_v7, %v437_v7  ;;  %v3788_v19 = vcombine.low %v727_v56, %v736_v57  ;;  %v224_v56 = vld [vmem:[%s5013_s6 + $0xb0] sm:$0xff]  ;;  %v4721_v7 = vld [vmem:[%s5990_s2 + $0x380] sm:$0xff]  }
  0x7e   : > { %2855 = vmatmul.mubr.bf16.gmra.mrb[40].mxu1 %v3737_v20  ;;  %4256 = vmatprep.subr.bf16.mxu0 %v4706_v23  ;;  %v338_v20 = vld [vmem:[%s5013_s6 + $0x40c] sm:$0xff]  ;;  %v541_v23 = vpack.i.b16 %v447_v59, %v447_v59  ;;  %v525_v28 = vrot.slane %v520_v17, %v5007_v44  ;;  %v233_v57 = vld [vmem:[%s5013_s6 + $0xf4] sm:$0xff] }
  0x7f   : > { %2862 = vmatprep.mubr.bf16.mxu1 %v3755_v24  ;;  %4319 = vmatpush3.bf16.msra.mxu1 %v4705_v25  ;;  %v330_v24 = vld [vmem:[%s5013_s6 + $0x3d0] sm:$0xff]  ;;  %v771_v27 = vmul.bf16 %v5192_v14, %v338_v20 }
  0x80   : > { %4320 = vmatprep.subr.bf16.mxu1 %v4707_v26  ;;  %v339_v25 = vld [vmem:[%s5013_s6 + $0x414] sm:$0xff]  ;;  %v762_v26 = vmul.bf16 %v5192_v14, %v329_v16  ;;  %v3805_v14 = vcombine.low %v745_v11, %v754_v12  ;;  %v251_v11 = vld [vmem:[%s5013_s6 + $0x17c] sm:$0xff]  ;;  %v4724_v12 = vld [vmem:[%s5990_s2 + $0x308] sm:$0xff]  }
  0x81   : > { %4257 = vmatpush3.bf16.msra.mxu0 %v4708_v29  ;;  %v532_v29 = vrot.slane %v527_v2, %v5007_v44  ;;  %v772_v31 = vmul.bf16 %v5197_v18, %v339_v25  ;;  %v4730_v25 = vld [vmem:[%s5990_s2 + $0x358] sm:$0xff]  }
  0x82   : > { %4258 = vmatprep.subr.bf16.mxu0 %v4710_v30  ;;  %v763_v30 = vmul.bf16 %v5197_v18, %v330_v24  ;;  %v3821_v35 = vcombine.high %v762_v26, %v771_v27  ;;  %v215_v18 = vld [vmem:[%s5013_s6 + $0x6c] sm:$0xff]  ;;  %v3820_v50 = vcombine.low %v762_v26, %v771_v27  ;;  %v268_v24 = vld [vmem:[%s5013_s6 + $0x1fc] sm:$0xff] }
  0x83   : > { %4321 = vmatpush3.bf16.msra.mxu1 %v4709_v33  ;;  %v546_v33 = vrot.slane %v541_v23, %v5007_v44  ;;  %v5369_v36 = vcombine.low %v525_v28, %v532_v29  ;;  %v259_v23 = vld [vmem:[%s5013_s6 + $0x1b8] sm:$0xff]  ;;  %v4729_v27 = vld [vmem:[%s5990_s2 + $0x390] sm:$0xff]   ;;  %v260_v28 = vld [vmem:[%s5013_s6 + $0x1c0] sm:$0xff] }
  0x84   : > { %2766 = vmatmul.mubr.bf16.gmra.mrb[44].mxu0 %v3752_v34  ;;  %4322 = vmatprep.subr.bf16.mxu1 %v4711_v37  ;;  %v3803_v34 = vcombine.low %v744_v9, %v753_v10  ;;  %v205_v37 = vld [vmem:[%s5013_s6 + $0x20] sm:$0xff]  ;;  %v3822_v52 = vcombine.low %v763_v30, %v772_v31  ;;  %v4723_v9 = vld [vmem:[%s5990_s2 + $0x3c8] sm:$0xff]   ;;  %v242_v10 = vld [vmem:[%s5013_s6 + $0x138] sm:$0xff] }
  0x85   : > { %2773 = vmatprep.mubr.bf16.mxu0 %v3770_v41  ;;  %4259 = vmatpush3.bf16.msra.mxu0 %v4712_v42  ;;  %v214_v41 = vld [vmem:[%s5013_s6 + $0x64] sm:$0xff]  ;;  %v3823_v42 = vcombine.high %v763_v30, %v772_v31  ;;  %v674_v13 = vmul.bf16 %v5369_v36, %v241_v5  ;;  %v683_v59 = vmul.bf16 %v5369_v36, %v250_v6  ;;  %v4731_v30 = vld [vmem:[%s5990_s2 + $0x3d8] sm:$0xff]  }
  0x86   : > { %2863 = vmatmul.mubr.bf16.gmra.mrb[44].mxu1 %v3754_v43  ;;  %4260 = vmatprep.subr.bf16.mxu0 %v4714_v46  ;;  %v5373_v43 = vcombine.low %v539_v32, %v546_v33  ;;  %v638_v46 = vmul.bf16 %v5369_v36, %v205_v37  ;;  %v269_v29 = vld [vmem:[%s5013_s6 + $0x204] sm:$0xff]  ;;  %v692_v31 = vmul.bf16 %v5369_v36, %v259_v23  ;;  %v4732_v33 = vld [vmem:[%s5990_s2 + $0x318] sm:$0xff]  }
  0x87   : > { %2870 = vmatprep.mubr.bf16.mxu1 %v3772_v47  ;;  %4323 = vmatpush3.bf16.msra.mxu1 %v4713_v48  ;;  %v647_v47 = vmul.bf16 %v5369_v36, %v214_v41  ;;  %v3740_v20 = vcombine.high %v674_v13, %v683_v59  ;;  %v701_v32 = vmul.bf16 %v5369_v36, %v268_v24  ;;  %v4733_v37 = vld [vmem:[%s5990_s2 + $0x398] sm:$0xff]   ;;  %v295_v6 = vld [vmem:[%s5013_s6 + $0x2c8] sm:$0xff]  ;;  %v313_v24 = vld [vmem:[%s5013_s6 + $0x350] sm:$0xff] }
  0x88   : > { %4324 = vmatprep.subr.bf16.mxu1 %v4715_v51  ;;  %v639_v48 = vmul.bf16 %v5373_v43, %v206_v45  ;;  %v648_v49 = vmul.bf16 %v5373_v43, %v215_v18  ;;  %v675_v16 = vmul.bf16 %v5373_v43, %v242_v10  ;;  %v684_v17 = vmul.bf16 %v5373_v43, %v251_v11  ;;  %v4736_v18 = vld [vmem:[%s5990_s2 + $0x320] sm:$0xff]   ;;  %v296_v11 = vld [vmem:[%s5013_s6 + $0x2d0] sm:$0xff] }
  0x89   : > { %4261 = vmatpush3.bf16.msra.mxu0 %v4716_v54  ;;  %v3706_v51 = vcombine.high %v638_v46, %v647_v47  ;;  %v232_v54 = vld [vmem:[%s5013_s6 + $0xec] sm:$0xff]  ;;  %v3739_v41 = vcombine.low %v674_v13, %v683_v59  ;;  %v3757_v45 = vcombine.high %v692_v31, %v701_v32  ;;  %v4747_v13 = vld [vmem:[%s5990_s2 + $0x3f8] sm:$0xff]   ;;  %v728_v59 = vmul.bf16 %v5369_v36, %v295_v6 }
  0x8a   : > { %4374 = vmatprep.subr.bf16.mxu0 %v4718_v55  ;;  %v3708_v55 = vcombine.high %v639_v48, %v648_v49  ;;  %v665_v60 = vmul.bf16 %v5369_v36, %v232_v54  ;;  %v3707_v3 = vcombine.low %v639_v48, %v648_v49  ;;  %v3742_v26 = vcombine.high %v675_v16, %v684_v17  ;;  %v286_v48 = vld [vmem:[%s5013_s6 + $0x284] sm:$0xff]  ;;  %v208_v6 = vld [vmem:[%s5013_s6 + $0x38] sm:$0xff] }
  0x8b   : > { %4325 = vmatpush3.bf16.msra.mxu1 %v4717_v58  ;;  %v656_v58 = vmul.bf16 %v5369_v36, %v223_v53  ;;  %v4738_v49 = vld [vmem:[%s5990_s2 + $0x368] sm:$0xff]  }
  0x8c   : > { %2774 = vmatmul.mubr.bf16.gmra.mrb[48].mxu0 %v3769_v61  ;;  %4438 = vmatprep.subr.bf16.mxu1 %v4719_v62  ;;  %v657_v61 = vmul.bf16 %v5373_v43, %v224_v56  ;;  %v666_v62 = vmul.bf16 %v5373_v43, %v233_v57  ;;  %v287_v53 = vld [vmem:[%s5013_s6 + $0x28c] sm:$0xff]  ;;  %v719_v56 = vmul.bf16 %v5369_v36, %v286_v48 }
  0x8d   : > { %2781 = vmatprep.mubr.bf16.mxu0 %v3787_v63  ;;  %v3705_v63 = vcombine.low %v638_v46, %v647_v47  ;;  %v3723_v1 = vcombine.high %v656_v58, %v665_v60  ;;  %v3722_v2 = vcombine.low %v656_v58, %v665_v60  ;;  %v3741_v46 = vcombine.low %v675_v16, %v684_v17  ;;  %v277_v47 = vld [vmem:[%s5013_s6 + $0x240] sm:$0xff]  ;;  %v4739_v54 = vld [vmem:[%s5990_s2 + $0x3e8] sm:$0xff]   ;;  %v4742_v58 = vld [vmem:[%s5990_s2 + $0x370] sm:$0xff]  }
  0x8e   : > { %2871 = vmatmul.mubr.bf16.gmra.mrb[48].mxu1 %v3771_v0  ;;  %v4720_v0 = vld [vmem:[%s5990_s2 + $0x300] sm:$0xff]   ;;  %v3725_v8 = vcombine.high %v657_v61, %v666_v62  ;;  %v3724_v22 = vcombine.low %v657_v61, %v666_v62  ;;  %v4740_v57 = vld [vmem:[%s5990_s2 + $0x328] sm:$0xff]   ;;  %v720_v61 = vmul.bf16 %v5373_v43, %v287_v53  ;;  %v729_v17 = vmul.bf16 %v5373_v43, %v296_v11 }
  0x8f   : > { %2878 = vmatprep.mubr.bf16.mxu1 %v3789_v4  ;;  %v4722_v4 = vld [vmem:[%s5990_s2 + $0x348] sm:$0xff]   ;;  %v5512_v16 = vld [vmem:[%s5990_s2 + $0x400] sm:$0xff]  }
  0x90   : > { %v4741_v62 = vld [vmem:[%s5990_s2 + $0x3a8] sm:$0xff]  }
  0x94   : > { %2782 = vmatmul.mubr.bf16.gmra.mrb[52].mxu0 %v3786_v15  ;;  %v4726_v15 = vld [vmem:[%s5990_s2 + $0x350] sm:$0xff]  }
  0x95   : > { %2789 = vmatprep.mubr.bf16.mxu0 %v3804_v39  ;;  %v4725_v39 = vld [vmem:[%s5990_s2 + $0x388] sm:$0xff]  }
  0x96   : > { %2879 = vmatmul.mubr.bf16.gmra.mrb[52].mxu1 %v3788_v19  ;;  %v4727_v19 = vld [vmem:[%s5990_s2 + $0x3d0] sm:$0xff]  }
  0x97   : > { %2886 = vmatprep.mubr.bf16.mxu1 %v3806_v21  ;;  %v4728_v21 = vld [vmem:[%s5990_s2 + $0x310] sm:$0xff]  }
  0x9c   : > { %2790 = vmatmul.mubr.bf16.gmra.mrb[56].mxu0 %v3803_v34  ;;  %v4734_v34 = vld [vmem:[%s5990_s2 + $0x360] sm:$0xff]  }
  0x9d   : > { %2797 = vmatprep.mubr.bf16.mxu0 %v3821_v35  ;;  %v693_v35 = vmul.bf16 %v5373_v43, %v260_v28 }
  0x9e   : > { %2887 = vmatmul.mubr.bf16.gmra.mrb[56].mxu1 %v3805_v14  ;;  %v702_v14 = vmul.bf16 %v5373_v43, %v269_v29  ;;  %v314_v29 = vld [vmem:[%s5013_s6 + $0x358] sm:$0xff] }
  0x9f   : > { %2894 = vmatprep.mubr.bf16.mxu1 %v3823_v42  ;;  %v4735_v42 = vld [vmem:[%s5990_s2 + $0x3e0] sm:$0xff]  }
  0xa0   : > { %v3758_v5 = vcombine.low %v693_v35, %v702_v14 }
  0xa4   : > { %2798 = vmatmul.mubr.bf16.gmra.mrb[60].mxu0 %v3820_v50  ;;  %v3759_v50 = vcombine.high %v693_v35, %v702_v14 }
  0xa5   : > { %2935 = vmatprep.mubr.bf16.mxu0 %v3706_v51  ;;  %v4737_v51 = vld [vmem:[%s5990_s2 + $0x3a0] sm:$0xff]  }
  0xa6   : > { %2895 = vmatmul.mubr.bf16.gmra.mrb[60].mxu1 %v3822_v52  ;;  %v278_v52 = vld [vmem:[%s5013_s6 + $0x248] sm:$0xff] }
  0xa7   : > { %3032 = vmatprep.mubr.bf16.mxu1 %v3708_v55  ;;  %v710_v55 = vmul.bf16 %v5369_v36, %v277_v47  ;;  %v711_v60 = vmul.bf16 %v5373_v43, %v278_v52  ;;  %v340_v47 = vld [vmem:[%s5013_s6 + $0x41c] sm:$0xff]  ;;  %v341_v52 = vld [vmem:[%s5013_s6 + $0x424] sm:$0xff] }
  0xa9   : > { %v3775_v23 = vcombine.low %v711_v60, %v720_v61 }
  0xac   : > { %2936 = vmatmul.mubr.bf16.vlgmr.msra.gmra.mrb[64].mxu0 %v3705_v63  ;;  %v400_v63 = vcombine.high %v5313_v38, %v5313_v38  ;;  %v4746_v38 = vld [vmem:[%s5990_s2 + $0x378] sm:$0xff]  }
  0xad   : > { %4375 = vmatpush3.bf16.msra.mxu0 %v4720_v0  ;;  %2943 = vmatprep.mubr.bf16.mxu0 %v3723_v1  ;;  %v3756_v0 = vcombine.low %v692_v31, %v701_v32  ;;  %v4743_v1 = vld [vmem:[%s5990_s2 + $0x3f0] sm:$0xff]   ;;  %v746_v31 = vmul.bf16 %v5369_v36, %v313_v24 }
  0xae   : > { %3033 = vmatmul.mubr.bf16.vlgmr.msra.gmra.mrb[64].mxu1 %v3707_v3  ;;  %4376 = vmatprep.subr.bf16.mxu0 %v4722_v4  ;;  %v3774_v3 = vcombine.high %v710_v55, %v719_v56  ;;  %v4744_v4 = vld [vmem:[%s5990_s2 + $0x330] sm:$0xff]   ;;  %v414_v10 = vrot.slane %v400_v63, %v5002_v40 }
  0xaf   : > { %4439 = vmatpush3.bf16.msra.mxu1 %v4721_v7  ;;  %3040 = vmatprep.mubr.bf16.mxu1 %v3725_v8  ;;  %v304_v7 = vld [vmem:[%s5013_s6 + $0x30c] sm:$0xff]  ;;  %v3776_v8 = vcombine.high %v711_v60, %v720_v61 }
  0xb0   : > { %4440 = vmatprep.subr.bf16.mxu1 %v4723_v9  ;;  %v4745_v9 = vld [vmem:[%s5990_s2 + $0x3b0] sm:$0xff]  }
  0xb1   : > { %4377 = vmatpush3.bf16.msra.mxu0 %v4724_v12  ;;  %v305_v12 = vld [vmem:[%s5013_s6 + $0x314] sm:$0xff] }
  0xb2   : > { %4378 = vmatprep.subr.bf16.mxu0 %v4726_v15  ;;  %v737_v15 = vmul.bf16 %v5369_v36, %v304_v7 }
  0xb3   : > { %4441 = vmatpush3.bf16.msra.mxu1 %v4725_v39  ;;  %v4748_v39 = vld [vmem:[%s5990_s2 + $0x338] sm:$0xff]  }
  0xb4   : > { %2944 = vmatmul.mubr.bf16.gmra.mrb[68].mxu0 %v3722_v2  ;;  %4442 = vmatprep.subr.bf16.mxu1 %v4727_v19  ;;  %v738_v2 = vmul.bf16 %v5373_v43, %v305_v12  ;;  %v4749_v19 = vld [vmem:[%s5990_s2 + $0x3b8] sm:$0xff]  }
  0xb5   : > { %2951 = vmatprep.mubr.bf16.mxu0 %v3740_v20  ;;  %4379 = vmatpush3.bf16.msra.mxu0 %v4728_v21  ;;  %v416_v20 = vcombine.high %v414_v10, %v414_v10  ;;  %v3773_v21 = vcombine.low %v710_v55, %v719_v56 }
  0xb6   : > { %3041 = vmatmul.mubr.bf16.gmra.mrb[68].mxu1 %v3724_v22  ;;  %4380 = vmatprep.subr.bf16.mxu0 %v4730_v25  ;;  %v3791_v22 = vcombine.high %v728_v59, %v737_v15  ;;  %v322_v25 = vld [vmem:[%s5013_s6 + $0x394] sm:$0xff] }
  0xb7   : > { %3048 = vmatprep.mubr.bf16.mxu1 %v3742_v26  ;;  %4443 = vmatpush3.bf16.msra.mxu1 %v4729_v27  ;;  %v3793_v26 = vcombine.high %v729_v17, %v738_v2  ;;  %v430_v27 = vrot.slane %v414_v10, %v5002_v40  ;;  %v444_v28 = vrot.slane %v416_v20, %v5002_v40 }
  0xb8   : > { %4444 = vmatprep.subr.bf16.mxu1 %v4731_v30  ;;  %v323_v30 = vld [vmem:[%s5013_s6 + $0x39c] sm:$0xff]  ;;  %v755_v32 = vmul.bf16 %v5369_v36, %v322_v25 }
  0xb9   : > { %4381 = vmatpush3.bf16.msra.mxu0 %v4732_v33  ;;  %v747_v33 = vmul.bf16 %v5373_v43, %v314_v29  ;;  %v446_v35 = vcombine.high %v430_v27, %v430_v27  ;;  %v448_v14 = vcombine.high %v444_v28, %v444_v28  ;;  %v243_v25 = vld [vmem:[%s5013_s6 + $0x140] sm:$0xff]  ;;  %v253_v29 = vld [vmem:[%s5013_s6 + $0x18c] sm:$0xff] }
  0xba   : > { %4382 = vmatprep.subr.bf16.mxu0 %v4734_v34  ;;  %v756_v34 = vmul.bf16 %v5373_v43, %v323_v30 }
  0xbb   : > { %4445 = vmatpush3.bf16.msra.mxu1 %v4733_v37  ;;  %v3790_v37 = vcombine.low %v728_v59, %v737_v15  ;;  %v234_v59 = vld [vmem:[%s5013_s6 + $0xfc] sm:$0xff] }
  0xbc   : > { %2952 = vmatmul.mubr.bf16.gmra.mrb[72].mxu0 %v3739_v41  ;;  %4446 = vmatprep.subr.bf16.mxu1 %v4735_v42  ;;  %v3808_v41 = vcombine.high %v746_v31, %v755_v32  ;;  %v548_v42 = vpack.i.b16 %v430_v27, %v430_v27  ;;  %v3810_v48 = vcombine.high %v747_v33, %v756_v34 }
  0xbd   : > { %2959 = vmatprep.mubr.bf16.mxu0 %v3757_v45  ;;  %4383 = vmatpush3.bf16.msra.mxu0 %v4736_v18  ;;  %v555_v45 = vpack.i.b16 %v444_v28, %v444_v28  ;;  %v3792_v18 = vcombine.low %v729_v17, %v738_v2  ;;  %v235_v17 = vld [vmem:[%s5013_s6 + $0x104] sm:$0xff] }
  0xbe   : > { %3049 = vmatmul.mubr.bf16.gmra.mrb[72].mxu1 %v3741_v46  ;;  %4384 = vmatprep.subr.bf16.mxu0 %v4738_v49  ;;  %v331_v46 = vld [vmem:[%s5013_s6 + $0x3d8] sm:$0xff]  ;;  %v562_v49 = vpack.i.b16 %v446_v35, %v446_v35  ;;  %v553_v55 = vrot.slane %v548_v42, %v5007_v44  ;;  %v244_v28 = vld [vmem:[%s5013_s6 + $0x148] sm:$0xff] }
  0xbf   : > { %3056 = vmatprep.mubr.bf16.mxu1 %v3759_v50  ;;  %4447 = vmatpush3.bf16.msra.mxu1 %v4737_v51  ;;  %v569_v50 = vpack.i.b16 %v448_v14, %v448_v14  ;;  %v332_v51 = vld [vmem:[%s5013_s6 + $0x3e0] sm:$0xff]  ;;  %v764_v53 = vmul.bf16 %v5369_v36, %v331_v46  ;;  %v560_v56 = vrot.slane %v555_v45, %v5007_v44  ;;  %v262_v45 = vld [vmem:[%s5013_s6 + $0x1d0] sm:$0xff] }
  0xc0   : > { %4448 = vmatprep.subr.bf16.mxu1 %v4739_v54  ;;  %v773_v54 = vmul.bf16 %v5369_v36, %v340_v47  ;;  %v567_v60 = vrot.slane %v562_v49, %v5007_v44  ;;  %v3809_v36 = vcombine.low %v747_v33, %v756_v34 }
  0xc1   : > { %4385 = vmatpush3.bf16.msra.mxu0 %v4740_v57  ;;  %v765_v57 = vmul.bf16 %v5373_v43, %v332_v51  ;;  %v574_v61 = vrot.slane %v569_v50, %v5007_v44 }
  0xc2   : > { %4386 = vmatprep.subr.bf16.mxu0 %v4742_v58  ;;  %v774_v58 = vmul.bf16 %v5373_v43, %v341_v52  ;;  %v3825_v63 = vcombine.high %v764_v53, %v773_v54  ;;  %v217_v43 = vld [vmem:[%s5013_s6 + $0x7c] sm:$0xff]  ;;  %v3824_v10 = vcombine.low %v764_v53, %v773_v54  ;;  %v279_v52 = vld [vmem:[%s5013_s6 + $0x250] sm:$0xff] }
  0xc3   : > { %4449 = vmatpush3.bf16.msra.mxu1 %v4741_v62  ;;  %v3807_v62 = vcombine.low %v746_v31, %v755_v32  ;;  %v288_v53 = vld [vmem:[%s5013_s6 + $0x294] sm:$0xff] }
  0xc4   : > { %2960 = vmatmul.mubr.bf16.gmra.mrb[76].mxu0 %v3756_v0  ;;  %4450 = vmatprep.subr.bf16.mxu1 %v4743_v1  ;;  %v5543_v0 = vcombine.low %v553_v55, %v560_v56  ;;  %v207_v1 = vld [vmem:[%s5013_s6 + $0x30] sm:$0xff]  ;;  %v3826_v12 = vcombine.low %v765_v57, %v774_v58  ;;  %v280_v55 = vld [vmem:[%s5013_s6 + $0x258] sm:$0xff] }
  0xc5   : > { %2967 = vmatprep.mubr.bf16.mxu0 %v3774_v3  ;;  %4387 = vmatpush3.bf16.msra.mxu0 %v4744_v4  ;;  %v216_v3 = vld [vmem:[%s5013_s6 + $0x74] sm:$0xff]  ;;  %v3827_v4 = vcombine.high %v765_v57, %v774_v58  ;;  %v289_v56 = vld [vmem:[%s5013_s6 + $0x29c] sm:$0xff] }
  0xc6   : > { %3057 = vmatmul.mubr.bf16.gmra.mrb[76].mxu1 %v3758_v5  ;;  %4388 = vmatprep.subr.bf16.mxu0 %v4746_v38  ;;  %v5547_v5 = vcombine.low %v567_v60, %v574_v61  ;;  %v640_v7 = vmul.bf16 %v5543_v0, %v207_v1  ;;  %v649_v38 = vmul.bf16 %v5543_v0, %v216_v3 }
  0xc7   : > { %3064 = vmatprep.mubr.bf16.mxu1 %v3776_v8  ;;  %4451 = vmatpush3.bf16.msra.mxu1 %v4745_v9  ;;  %v676_v30 = vmul.bf16 %v5543_v0, %v243_v25  ;;  %v712_v57 = vmul.bf16 %v5543_v0, %v279_v52  ;;  %v721_v58 = vmul.bf16 %v5543_v0, %v288_v53 }
  0xc8   : > { %4452 = vmatprep.subr.bf16.mxu1 %v4747_v13  ;;  %v641_v8 = vmul.bf16 %v5547_v5, %v208_v6  ;;  %v650_v9 = vmul.bf16 %v5547_v5, %v217_v43  ;;  %v3710_v11 = vcombine.high %v640_v7, %v649_v38  ;;  %v225_v13 = vld [vmem:[%s5013_s6 + $0xb8] sm:$0xff]  ;;  %v677_v32 = vmul.bf16 %v5547_v5, %v244_v28 }
  0xc9   : > { %4389 = vmatpush3.bf16.msra.mxu0 %v4748_v39  ;;  %v226_v39 = vld [vmem:[%s5013_s6 + $0xc0] sm:$0xff]  ;;  %v658_v2 = vmul.bf16 %v5543_v0, %v225_v13  ;;  %v686_v33 = vmul.bf16 %v5547_v5, %v253_v29  ;;  %v695_v47 = vmul.bf16 %v5547_v5, %v262_v45  ;;  %v713_v61 = vmul.bf16 %v5547_v5, %v280_v55 }
  0xca   : > { %4511 = vmatprep.subr.bf16.mxu0 %v5512_v16  ;;  %v3712_v15 = vcombine.high %v641_v8, %v650_v9  ;;  %v659_v20 = vmul.bf16 %v5547_v5, %v226_v39  ;;  %v3711_v24 = vcombine.low %v641_v8, %v650_v9  ;;  %v3778_v6 = vcombine.high %v712_v57, %v721_v58  ;;  %v297_v8 = vld [vmem:[%s5013_s6 + $0x2d8] sm:$0xff]  ;;  %v307_v39 = vld [vmem:[%s5013_s6 + $0x324] sm:$0xff] }
  0xcb   : > { %4453 = vmatpush3.bf16.msra.mxu1 %v4749_v19  ;;  %v667_v19 = vmul.bf16 %v5543_v0, %v234_v59  ;;  %v3746_v42 = vcombine.high %v677_v32, %v686_v33  ;;  %v3745_v51 = vcombine.low %v677_v32, %v686_v33  ;;  %v306_v9 = vld [vmem:[%s5013_s6 + $0x31c] sm:$0xff]  ;;  %v324_v32 = vld [vmem:[%s5013_s6 + $0x3a4] sm:$0xff] }
  0xcc   : > { %2968 = vmatmul.mubr.bf16.gmra.mrb[80].mxu0 %v3773_v21  ;;  %4529 = vmatprep.subr.bf16.mxu1 %v5512_v16  ;;  %v668_v21 = vmul.bf16 %v5547_v5, %v235_v17 }
  0xcd   : > { %2975 = vmatprep.mubr.bf16.mxu0 %v3791_v22  ;;  %v3709_v22 = vcombine.low %v640_v7, %v649_v38  ;;  %v3726_v34 = vcombine.low %v658_v2, %v667_v19 }
  0xce   : > { %3065 = vmatmul.mubr.bf16.gmra.mrb[80].mxu1 %v3775_v23  ;;  %v3727_v23 = vcombine.high %v658_v2, %v667_v19  ;;  %v3729_v27 = vcombine.high %v659_v20, %v668_v21  ;;  %v3728_v14 = vcombine.low %v659_v20, %v668_v21  ;;  %v730_v19 = vmul.bf16 %v5543_v0, %v297_v8 }
  0xcf   : > { %3072 = vmatprep.mubr.bf16.mxu1 %v3793_v26  ;;  %v252_v26 = vld [vmem:[%s5013_s6 + $0x184] sm:$0xff]  ;;  %v739_v20 = vmul.bf16 %v5543_v0, %v306_v9 }
  0xd0   : > { %v685_v31 = vmul.bf16 %v5543_v0, %v252_v26  ;;  %v3777_v26 = vcombine.low %v712_v57, %v721_v58 }
  0xd1   : > { %v3794_v57 = vcombine.low %v730_v19, %v739_v20 }
  0xd2   : > { %v3744_v35 = vcombine.high %v676_v30, %v685_v31  ;;  %v3743_v49 = vcombine.low %v676_v30, %v685_v31  ;;  %v3795_v30 = vcombine.high %v730_v19, %v739_v20  ;;  %v315_v31 = vld [vmem:[%s5013_s6 + $0x360] sm:$0xff] }
  0xd4   : > { %2976 = vmatmul.mubr.bf16.gmra.mrb[84].mxu0 %v3790_v37  ;;  %v261_v37 = vld [vmem:[%s5013_s6 + $0x1c8] sm:$0xff] }
  0xd5   : > { %2983 = vmatprep.mubr.bf16.mxu0 %v3808_v41  ;;  %v270_v41 = vld [vmem:[%s5013_s6 + $0x20c] sm:$0xff] }
  0xd6   : > { %3073 = vmatmul.mubr.bf16.gmra.mrb[84].mxu1 %v3792_v18  ;;  %v271_v18 = vld [vmem:[%s5013_s6 + $0x214] sm:$0xff]  ;;  %v703_v46 = vmul.bf16 %v5543_v0, %v270_v41 }
  0xd7   : > { %3080 = vmatprep.mubr.bf16.mxu1 %v3810_v48  ;;  %v704_v48 = vmul.bf16 %v5547_v5, %v271_v18 }
  0xd9   : > { %v3763_v54 = vcombine.high %v695_v47, %v704_v48  ;;  %v3762_v38 = vcombine.low %v695_v47, %v704_v48  ;;  %v325_v47 = vld [vmem:[%s5013_s6 + $0x3ac] sm:$0xff] }
  0xda   : > { %v758_v55 = vmul.bf16 %v5547_v5, %v325_v47 }
  0xdc   : > { %2984 = vmatmul.mubr.bf16.gmra.mrb[88].mxu0 %v3807_v62  ;;  %v722_v62 = vmul.bf16 %v5547_v5, %v289_v56 }
  0xdd   : > { %2991 = vmatprep.mubr.bf16.mxu0 %v3825_v63 }
  0xde   : > { %3081 = vmatmul.mubr.bf16.gmra.mrb[88].mxu1 %v3809_v36  ;;  %v3780_v13 = vcombine.high %v713_v61, %v722_v62 }
  0xdf   : > { %3088 = vmatprep.mubr.bf16.mxu1 %v3827_v4 }
  0xe4   : > { %2992 = vmatmul.mubr.bf16.gmra.mrb[92].mxu0 %v3824_v10 }
  0xe5   : > { %3129 = vmatprep.mubr.bf16.mxu0 %v3710_v11 }
  0xe6   : > { %3089 = vmatmul.mubr.bf16.gmra.mrb[92].mxu1 %v3826_v12 }
  0xe7   : > { %3226 = vmatprep.mubr.bf16.mxu1 %v3712_v15  ;;  %v298_v15 = vld [vmem:[%s5013_s6 + $0x2e0] sm:$0xff] }
  0xec   : > { %3130 = vmatmul.mubr.bf16.vlgmr.msra.gmra.mrb[96].mxu0 %v3709_v22 }
  0xed   : > { %4512 = vmatpush3.bf16.msra.mxu0 %v5512_v16  ;;  %3137 = vmatprep.mubr.bf16.mxu0 %v3727_v23  ;;  %v731_v23 = vmul.bf16 %v5547_v5, %v298_v15 }
  0xee   : > { %3227 = vmatmul.mubr.bf16.vlgmr.msra.gmra.mrb[96].mxu1 %v3711_v24  ;;  %v740_v24 = vmul.bf16 %v5547_v5, %v307_v39 }
  0xef   : > { %4530 = vmatpush3.bf16.msra.mxu1 %v5512_v16  ;;  %3234 = vmatprep.mubr.bf16.mxu1 %v3729_v27  ;;  %v694_v16 = vmul.bf16 %v5543_v0, %v261_v37 }
  0xf0   : > { %v3797_v45 = vcombine.high %v731_v23, %v740_v24 }
  0xf1   : > { %v3761_v50 = vcombine.high %v694_v16, %v703_v46  ;;  %v3760_v36 = vcombine.low %v694_v16, %v703_v46  ;;  %v5607_v16 = vmul.bf16 %v5543_v0, %v315_v31  ;;  %v316_v46 = vld [vmem:[%s5013_s6 + $0x368] sm:$0xff]  ;;  %v218_v31 = vld [vmem:[%s5013_s6 + $0x84] sm:$0xf] }
  0xf4   : > { %3138 = vmatmul.mubr.bf16.gmra.mrb[100].mxu0 %v3726_v34 }
  0xf5   : > { %3145 = vmatprep.mubr.bf16.mxu0 %v3744_v35  ;;  %v3779_v35 = vcombine.low %v713_v61, %v722_v62 }
  0xf6   : > { %3235 = vmatmul.mubr.bf16.gmra.mrb[100].mxu1 %v3728_v14  ;;  %v3687_v14 = vld.sshfl [vmem:[%s5989_s1 + $0x10] sm:$0x1 pattern:$0x75316420] }
  0xf7   : > { %3242 = vmatprep.mubr.bf16.mxu1 %v3746_v42 }
  0xfc   : > { %3146 = vmatmul.mubr.bf16.gmra.mrb[104].mxu0 %v3743_v49 }
  0xfd   : > { %3153 = vmatprep.mubr.bf16.mxu0 %v3761_v50  ;;  %v757_v50 = vmul.bf16 %v5543_v0, %v324_v32 }
  0xfe   : > { %3243 = vmatmul.mubr.bf16.gmra.mrb[104].mxu1 %v3745_v51  ;;  %v462_v51 = vrot.slane %v3687_v14, %v5002_v40  ;;  %v333_v40 = vld [vmem:[%s5013_s6 + $0x3e8] sm:$0xff]  ;;  %v281_v14 = vld [vmem:[%s5013_s6 + $0x260] sm:$0xf] }
  0xff   : > { %v4006_v60 = vpop.f32.mrb[0].mxu0  ;;  %3250 = vmatprep.mubr.bf16.mxu1 %v3763_v54  ;;  %v749_v54 = vmul.bf16 %v5547_v5, %v316_v46  ;;  %v3812_v62 = vcombine.high %v5607_v16, %v757_v50  ;;  %v5623_v9 = vmul.bf16 %v5543_v0, %v333_v40  ;;  %v245_v40 = vld [vmem:[%s5013_s6 + $0x150] sm:$0xf] }
 0x100   : > { %v4007_v63 = vpop.f32.mrb[1].mxu0  ;;  %v4070_v1 = vpop.f32.mrb[0].mxu1 }
 0x101   : > { %v4008_v3 = vadd.f32 %v4007_v63, %v4006_v60  ;;  %v4009_v4 = vpop.f32.mrb[2].mxu0  ;;  %v4071_v43 = vpop.f32.mrb[1].mxu1  ;;  %v576_v63 = vpack.i.b16 %v462_v51, %v462_v51 }
 0x102   : > { %v4010_v7 = vpop.f32.mrb[3].mxu0  ;;  %v4072_v10 = vadd.f32 %v4071_v43, %v4070_v1  ;;  %v4073_v11 = vpop.f32.mrb[2].mxu1 }
 0x103   : > { %v4011_v12 = vadd.f32 %v4010_v7, %v4009_v4  ;;  %v4074_v59 = vpop.f32.mrb[3].mxu1  ;;  %v342_v4 = vld [vmem:[%s5013_s6 + $0x42c] sm:$0xff]  ;;  %v581_v15 = vrot.slane %v576_v63, %v5007_v44  ;;  %v254_v63 = vld [vmem:[%s5013_s6 + $0x194] sm:$0xf] }
 0x104   : > { %3154 = vmatmul.mubr.bf16.gmra.mrb[108].mxu0 %v3760_v36  ;;  %v5593_v17 = vadd.f32 %v4072_v10, %v4008_v3  ;;  %v4075_v2 = vadd.f32 %v4074_v59, %v4073_v11  ;;  %v3796_v3 = vcombine.low %v731_v23, %v740_v24  ;;  %v334_v10 = vld [vmem:[%s5013_s6 + $0x3f0] sm:$0xff]  ;;  %v775_v59 = vmul.bf16 %v5543_v0, %v342_v4 }
 0x105   : > { %3161 = vmatprep.mubr.bf16.mxu0 %v3778_v6  ;;  %v343_v11 = vld [vmem:[%s5013_s6 + $0x434] sm:$0xff]  ;;  %v5634_v19 = vmul.bf16 %v5547_v5, %v334_v10  ;;  %v3811_v23 = vcombine.low %v5607_v16, %v757_v50 }
 0x106   : > { %3251 = vmatmul.mubr.bf16.gmra.mrb[108].mxu1 %v3762_v38  ;;  %v5597_v21 = vadd.f32 %v4075_v2, %v4011_v12  ;;  %v3814_v38 = vcombine.high %v749_v54, %v758_v55  ;;  %v5637_v20 = vmul.bf16 %v5547_v5, %v343_v11  ;;  %v3828_v51 = vcombine.low %v5623_v9, %v775_v59  ;;  %v326_v10 = vld [vmem:[%s5013_s6 + $0x3b4] sm:$0xf] }
 0x107   : > { %v4012_v22 = vpop.f32.mrb[4].mxu0  ;;  %3258 = vmatprep.mubr.bf16.mxu1 %v3780_v13 }
 0x108   : > { %v4013_v25 = vpop.f32.mrb[5].mxu0 }
 0x109   : > { %v4076_v27 = vpop.f32.mrb[4].mxu1  ;;  %v4014_v28 = vadd.f32 %v4013_v25, %v4012_v22  ;;  %v4015_v29 = vpop.f32.mrb[6].mxu0  ;;  %v3829_v25 = vcombine.high %v5623_v9, %v775_v59  ;;  %v317_v9 = vld [vmem:[%s5013_s6 + $0x370] sm:$0xf] }
 0x10a   : > { %v4077_v33 = vpop.f32.mrb[5].mxu1  ;;  %v4016_v34 = vpop.f32.mrb[7].mxu0 }
 0x10b   : > { %v4078_v37 = vadd.f32 %v4077_v33, %v4076_v27  ;;  %v4079_v41 = vpop.f32.mrb[6].mxu1  ;;  %v4017_v42 = vadd.f32 %v4016_v34, %v4015_v29  ;;  %v3813_v29 = vcombine.low %v749_v54, %v758_v55  ;;  %v3831_v34 = vcombine.high %v5634_v19, %v5637_v20 }
 0x10c   : > { %v4080_v18 = vpop.f32.mrb[7].mxu1  ;;  %3162 = vmatmul.mubr.bf16.gmra.mrb[112].mxu0 %v3777_v26  ;;  %v5641_v26 = vcombine.low %v581_v15, %v581_v15 }
 0x10d   : > { %v5611_v48 = vadd.f32 %v4078_v37, %v4014_v28  ;;  %v4081_v49 = vadd.f32 %v4080_v18, %v4079_v41  ;;  %3169 = vmatprep.mubr.bf16.mxu0 %v3795_v30  ;;  %v209_v30 = vld [vmem:[%s5013_s6 + $0x40] sm:$0xf]  ;;  %v290_v37 = vld [vmem:[%s5013_s6 + $0x2a4] sm:$0xf] }
 0x10e   : > { %3259 = vmatmul.mubr.bf16.gmra.mrb[112].mxu1 %v3779_v35  ;;  %v651_v18 = vmul.bf16 %v5641_v26, %v218_v31  ;;  %v714_v47 = vmul.bf16 %v5641_v26, %v281_v14  ;;  %v678_v59 = vmul.bf16 %v5641_v26, %v245_v40  ;;  %v687_v15 = vmul.bf16 %v5641_v26, %v254_v63  ;;  %v272_v31 = vld [vmem:[%s5013_s6 + $0x21c] sm:$0xf] }
 0x10f   : > { %v5615_v52 = vadd.f32 %v4081_v49, %v4017_v42  ;;  %v4018_v53 = vpop.f32.mrb[8].mxu0  ;;  %3266 = vmatprep.mubr.bf16.mxu1 %v3797_v45  ;;  %v642_v45 = vmul.bf16 %v5641_v26, %v209_v30  ;;  %v723_v49 = vmul.bf16 %v5641_v26, %v290_v37  ;;  %v263_v30 = vld [vmem:[%s5013_s6 + $0x1d8] sm:$0xf] }
 0x110   : > { %v4019_v56 = vpop.f32.mrb[9].mxu0 }
 0x111   : > { %v4082_v58 = vpop.f32.mrb[8].mxu1  ;;  %v4020_v60 = vadd.f32 %v4019_v56, %v4018_v53  ;;  %v4021_v61 = vpop.f32.mrb[10].mxu0  ;;  %v227_v53 = vld [vmem:[%s5013_s6 + $0xc8] sm:$0xf]  ;;  %v3781_v4 = vcombine.low %v714_v47, %v723_v49  ;;  %v705_v47 = vmul.bf16 %v5641_v26, %v272_v31 }
 0x112   : > { %v4083_v36 = vpop.f32.mrb[9].mxu1  ;;  %v4022_v1 = vpop.f32.mrb[11].mxu0 }
 0x113   : > { %v4084_v6 = vadd.f32 %v4083_v36, %v4082_v58  ;;  %v4085_v43 = vpop.f32.mrb[10].mxu1  ;;  %v4023_v7 = vadd.f32 %v4022_v1, %v4021_v61  ;;  %v236_v58 = vld [vmem:[%s5013_s6 + $0x10c] sm:$0xf] }
 0x114   : > { %v4086_v8 = vpop.f32.mrb[11].mxu1  ;;  %3170 = vmatmul.mubr.bf16.gmra.mrb[116].mxu0 %v3794_v57  ;;  %v3713_v57 = vcombine.low %v642_v45, %v651_v18  ;;  %v344_v45 = vld [vmem:[%s5013_s6 + $0x43c] sm:$0xf] }
 0x115   : > { %v5627_v12 = vadd.f32 %v4084_v6, %v4020_v60  ;;  %v4087_v13 = vadd.f32 %v4086_v8, %v4085_v43  ;;  %3177 = vmatprep.mubr.bf16.mxu0 %v3812_v62  ;;  %v3830_v62 = vcombine.low %v5634_v19, %v5637_v20  ;;  %v299_v6 = vld [vmem:[%s5013_s6 + $0x2e8] sm:$0xf]  ;;  %v308_v43 = vld [vmem:[%s5013_s6 + $0x32c] sm:$0xf]  ;;  %v669_v8 = vmul.bf16 %v5641_v26, %v236_v58 }
 0x116   : > { %3267 = vmatmul.mubr.bf16.gmra.mrb[116].mxu1 %v3796_v3  ;;  %v741_v19 = vmul.bf16 %v5641_v26, %v308_v43 }
 0x117   : > { %v5631_v39 = vadd.f32 %v4087_v13, %v4023_v7  ;;  %v4024_v2 = vpop.f32.mrb[12].mxu0  ;;  %3274 = vmatprep.mubr.bf16.mxu1 %v3814_v38  ;;  %v660_v38 = vmul.bf16 %v5641_v26, %v227_v53  ;;  %v777_v53 = vmul.bf16 %v5641_v26, %v344_v45 }
 0x118   : > { %v4025_v22 = vpop.f32.mrb[13].mxu0 }
 0x119   : > { %v4088_v24 = vpop.f32.mrb[12].mxu1  ;;  %v4026_v0 = vadd.f32 %v4025_v22, %v4024_v2  ;;  %v4027_v44 = vpop.f32.mrb[14].mxu0  ;;  %v732_v2 = vmul.bf16 %v5641_v26, %v299_v6 }
 0x11a   : > { %v4089_v27 = vpop.f32.mrb[13].mxu1  ;;  %v4028_v28 = vpop.f32.mrb[15].mxu0 }
 0x11b   : > { %v4090_v32 = vadd.f32 %v4089_v27, %v4088_v24  ;;  %v4091_v5 = vpop.f32.mrb[14].mxu1  ;;  %v4029_v33 = vadd.f32 %v4028_v28, %v4027_v44  ;;  %v759_v24 = vmul.bf16 %v5641_v26, %v326_v10  ;;  %v3730_v44 = vcombine.low %v660_v38, %v669_v8 }
 0x11c   : > { %v4092_v35 = vpop.f32.mrb[15].mxu1  ;;  %3178 = vmatmul.mubr.bf16.gmra.mrb[120].mxu0 %v3811_v23  ;;  %v750_v23 = vmul.bf16 %v5641_v26, %v317_v9 }
 0x11d   : > { %v5649_v41 = vadd.f32 %v4090_v32, %v4026_v0  ;;  %v4093_v42 = vadd.f32 %v4092_v35, %v4091_v5  ;;  %3185 = vmatprep.mubr.bf16.mxu0 %v3829_v25 }
 0x11e   : > { %3275 = vmatmul.mubr.bf16.gmra.mrb[120].mxu1 %v3813_v29  ;;  %v3747_v29 = vcombine.low %v678_v59, %v687_v15  ;;  %v3815_v37 = vcombine.low %v750_v23, %v759_v24 }
 0x11f   : > { %v5653_v16 = vadd.f32 %v4093_v42, %v4029_v33  ;;  %v4030_v46 = vpop.f32.mrb[16].mxu0  ;;  %3282 = vmatprep.mubr.bf16.mxu1 %v3831_v34  ;;  %v3798_v33 = vcombine.low %v732_v2, %v741_v19  ;;  %v335_v42 = vld [vmem:[%s5013_s6 + $0x3f8] sm:$0xf]  ;;  %s175_s6 = sand.u32 1, %s4798_s12  }
 0x120   : > { %v4031_v50 = vpop.f32.mrb[17].mxu0  ;;  %s3684_s11 = sshll.u32 %s175_s6, 7 }
 0x121   : > { %v4094_v54 = vpop.f32.mrb[16].mxu1  ;;  %v4032_v55 = vadd.f32 %v4031_v50, %v4030_v46  ;;  %v4033_v56 = vpop.f32.mrb[18].mxu0  ;;  %v696_v46 = vmul.bf16 %v5641_v26, %v263_v30  ;;  %s5845_s12 = scalar_lea.vmem [#allocation2], %s3684_s11  }
 0x122   : > { %v4095_v60 = vpop.f32.mrb[17].mxu1  ;;  %v4034_v61 = vpop.f32.mrb[19].mxu0 }
 0x123   : > { %v4096_v36 = vadd.f32 %v4095_v60, %v4094_v54  ;;  %v4097_v1 = vpop.f32.mrb[18].mxu1  ;;  %v4035_v3 = vadd.f32 %v4034_v61, %v4033_v56 }
 0x124   : > { %v4098_v7 = vpop.f32.mrb[19].mxu1  ;;  %3186 = vmatmul.mubr.bf16.gmra.mrb[124].mxu0 %v3828_v51  ;;  %v768_v51 = vmul.bf16 %v5641_v26, %v335_v42 }
 0x125   : > { %v5670_v11 = vadd.f32 %v4096_v36, %v4032_v55  ;;  %v4099_v13 = vadd.f32 %v4098_v7, %v4097_v1  ;;  %4513 = vmatprep.mubr.msk.bf16.mxu0 %vm2490_vm0, %v3713_v57  ;;  %v3764_v57 = vcombine.low %v696_v46, %v705_v47 }
 0x126   : > { %3283 = vmatmul.mubr.bf16.gmra.mrb[124].mxu1 %v3830_v62  ;;  %v3832_v63 = vcombine.low %v768_v51, %v777_v53 }
 0x127   : > { %v5677_v20 = vadd.f32 %v4099_v13, %v4035_v3  ;;  %v4036_v22 = vpop.f32.mrb[20].mxu0  ;;  %4521 = vmatprep.mubr.msk.bf16.mxu1 %vm2490_vm0, %v3781_v4 }
 0x128   : > { %v4037_v0 = vpop.f32.mrb[21].mxu0 }
 0x129   : > { %v4100_v25 = vpop.f32.mrb[20].mxu1  ;;  %v4038_v27 = vadd.f32 %v4037_v0, %v4036_v22  ;;  %v4039_v28 = vpop.f32.mrb[22].mxu0 }
 0x12a   : > { %v4101_v32 = vpop.f32.mrb[21].mxu1  ;;  %v4040_v5 = vpop.f32.mrb[23].mxu0 }
 0x12b   : > { %v4102_v34 = vadd.f32 %v4101_v32, %v4100_v25  ;;  %v4103_v35 = vpop.f32.mrb[22].mxu1  ;;  %v4041_v14 = vadd.f32 %v4040_v5, %v4039_v28 }
 0x12c   : > { %v4104_v18 = vpop.f32.mrb[23].mxu1  ;;  %4514 = vmatmul.mubr.msk.bf16.vlgmr.msra.gmra.mrb[128].mxu0 %vm2490_vm0, %v3730_v44 }
 0x12d   : > { %v5689_v49 = vadd.f32 %v4102_v34, %v4038_v27  ;;  %v4105_v50 = vadd.f32 %v4104_v18, %v4103_v35  ;;  %4517 = vmatprep.mubr.msk.bf16.mxu0 %vm2490_vm0, %v3747_v29 }
 0x12e   : > { %4522 = vmatmul.mubr.msk.bf16.vlgmr.msra.gmra.mrb[128].mxu1 %vm2490_vm0, %v3798_v33 }
 0x12f   : > { %v5695_v54 = vadd.f32 %v4105_v50, %v4041_v14  ;;  %v4042_v55 = vpop.f32.mrb[24].mxu0  ;;  %4525 = vmatprep.mubr.msk.bf16.mxu1 %vm2490_vm0, %v3815_v37 }
 0x130   : > { %v4043_v56 = vpop.f32.mrb[25].mxu0 }
 0x131   : > { %v4106_v58 = vpop.f32.mrb[24].mxu1  ;;  %v4044_v60 = vadd.f32 %v4043_v56, %v4042_v55  ;;  %v4045_v61 = vpop.f32.mrb[26].mxu0 }
 0x132   : > { %v4107_v62 = vpop.f32.mrb[25].mxu1  ;;  %v4046_v40 = vpop.f32.mrb[27].mxu0 }
 0x133   : > { %v4108_v36 = vadd.f32 %v4107_v62, %v4106_v58  ;;  %v4109_v1 = vpop.f32.mrb[26].mxu1  ;;  %v4047_v3 = vadd.f32 %v4046_v40, %v4045_v61 }
 0x134   : > { %v4110_v4 = vpop.f32.mrb[27].mxu1  ;;  %4518 = vmatmul.mubr.msk.bf16.gmra.mrb[132].mxu0 %vm2490_vm0, %v3764_v57 }
 0x135   : > { %v5699_v26 = vadd.f32 %v4108_v36, %v4044_v60  ;;  %v4111_v6 = vadd.f32 %v4110_v4, %v4109_v1 }
 0x136   : > { %4526 = vmatmul.mubr.msk.bf16.gmra.mrb[132].mxu1 %vm2490_vm0, %v3832_v63 }
 0x137   : > { %v5702_v43 = vadd.f32 %v4111_v6, %v4047_v3  ;;  %v4048_v7 = vpop.f32.mrb[28].mxu0 }
 0x138   : > { %v4049_v38 = vpop.f32.mrb[29].mxu0 }
 0x139   : > { %v4112_v8 = vpop.f32.mrb[28].mxu1  ;;  %v4050_v9 = vadd.f32 %v4049_v38, %v4048_v7  ;;  %v4051_v10 = vpop.f32.mrb[30].mxu0 }
 0x13a   : > { %v4113_v13 = vpop.f32.mrb[29].mxu1  ;;  %v4052_v59 = vpop.f32.mrb[31].mxu0 }
 0x13b   : > { %v4114_v15 = vadd.f32 %v4113_v13, %v4112_v8  ;;  %v4115_v2 = vpop.f32.mrb[30].mxu1  ;;  %v4053_v19 = vadd.f32 %v4052_v59, %v4051_v10 }
 0x13c   : > { %v4116_v22 = vpop.f32.mrb[31].mxu1 }
 0x13d   : > { %v5704_v23 = vadd.f32 %v4114_v15, %v4050_v9  ;;  %v4117_v24 = vadd.f32 %v4116_v22, %v4115_v2 }
 0x13f   : > { %v5706_v0 = vadd.f32 %v4117_v24, %v4053_v19  ;;  %v4134_v44 = vpop.f32.mrb[32].mxu0 }
 0x140   : > { %v4135_v25 = vpop.f32.mrb[33].mxu0 }
 0x141   : > { %v4198_v27 = vpop.f32.mrb[32].mxu1  ;;  %v4136_v28 = vadd.f32 %v4135_v25, %v4134_v44  ;;  %v4137_v29 = vpop.f32.mrb[34].mxu0 }
 0x142   : > { %v4199_v30 = vpop.f32.mrb[33].mxu1  ;;  %v4138_v31 = vpop.f32.mrb[35].mxu0 }
 0x143   : > { %v2744_v32 = vadd.f32 %v4136_v28, %v5593_v17  ;;  %v4200_v5 = vadd.f32 %v4199_v30, %v4198_v27  ;;  %v4201_v33 = vpop.f32.mrb[34].mxu1  ;;  %v4139_v34 = vadd.f32 %v4138_v31, %v4137_v29 }
 0x144   : > { %v4202_v35 = vpop.f32.mrb[35].mxu1 }
 0x145   : > { %v5709_v14 = vadd.f32 %v4200_v5, %v2744_v32  ;;  %v2747_v37 = vadd.f32 %v4139_v34, %v5597_v21  ;;  %v4203_v42 = vadd.f32 %v4202_v35, %v4201_v33 }
 0x147   : > { %v5712_v45 = vadd.f32 %v4203_v42, %v2747_v37  ;;  %v4140_v18 = vpop.f32.mrb[36].mxu0 }
 0x148   : > { %v4141_v46 = vpop.f32.mrb[37].mxu0 }
 0x149   : > { %v4204_v47 = vpop.f32.mrb[36].mxu1  ;;  %v4142_v50 = vadd.f32 %v4141_v46, %v4140_v18  ;;  %v4143_v51 = vpop.f32.mrb[38].mxu0 }
 0x14a   : > { %v4205_v53 = vpop.f32.mrb[37].mxu1  ;;  %v4144_v55 = vpop.f32.mrb[39].mxu0 }
 0x14b   : > { %v2752_v17 = vadd.f32 %v4142_v50, %v5611_v48  ;;  %v4206_v56 = vadd.f32 %v4205_v53, %v4204_v47  ;;  %v4207_v57 = vpop.f32.mrb[38].mxu1  ;;  %v4145_v58 = vadd.f32 %v4144_v55, %v4143_v51 }
 0x14c   : > { %v4208_v60 = vpop.f32.mrb[39].mxu1 }
 0x14d   : > { %v5715_v61 = vadd.f32 %v4206_v56, %v2752_v17  ;;  %v2755_v21 = vadd.f32 %v4145_v58, %v5615_v52  ;;  %v4209_v62 = vadd.f32 %v4208_v60, %v4207_v57 }
 0x14f   : > { %v5718_v40 = vadd.f32 %v4209_v62, %v2755_v21  ;;  %v4146_v63 = vpop.f32.mrb[40].mxu0 }
 0x150   : > { %v4147_v36 = vpop.f32.mrb[41].mxu0 }
 0x151   : > { %v4210_v1 = vpop.f32.mrb[40].mxu1  ;;  %v4148_v3 = vadd.f32 %v4147_v36, %v4146_v63  ;;  %v4149_v4 = vpop.f32.mrb[42].mxu0 }
 0x152   : > { %v4211_v6 = vpop.f32.mrb[41].mxu1  ;;  %v4150_v7 = vpop.f32.mrb[43].mxu0 }
 0x153   : > { %v2760_v48 = vadd.f32 %v4148_v3, %v5627_v12  ;;  %v4212_v38 = vadd.f32 %v4211_v6, %v4210_v1  ;;  %v4213_v8 = vpop.f32.mrb[42].mxu1  ;;  %v4151_v9 = vadd.f32 %v4150_v7, %v4149_v4 }
 0x154   : > { %v4214_v10 = vpop.f32.mrb[43].mxu1 }
 0x155   : > { %v5721_v13 = vadd.f32 %v4212_v38, %v2760_v48  ;;  %v2763_v52 = vadd.f32 %v4151_v9, %v5631_v39  ;;  %v4215_v59 = vadd.f32 %v4214_v10, %v4213_v8 }
 0x157   : > { %v5724_v15 = vadd.f32 %v4215_v59, %v2763_v52  ;;  %v4152_v2 = vpop.f32.mrb[44].mxu0 }
 0x158   : > { %v4153_v19 = vpop.f32.mrb[45].mxu0 }
 0x159   : > { %v4216_v22 = vpop.f32.mrb[44].mxu1  ;;  %v4154_v24 = vadd.f32 %v4153_v19, %v4152_v2  ;;  %v4155_v44 = vpop.f32.mrb[46].mxu0 }
 0x15a   : > { %v4217_v25 = vpop.f32.mrb[45].mxu1  ;;  %v4156_v27 = vpop.f32.mrb[47].mxu0 }
 0x15b   : > { %v2768_v12 = vadd.f32 %v4154_v24, %v5649_v41  ;;  %v4218_v28 = vadd.f32 %v4217_v25, %v4216_v22  ;;  %v4219_v29 = vpop.f32.mrb[46].mxu1  ;;  %v4157_v30 = vadd.f32 %v4156_v27, %v4155_v44 }
 0x15c   : > { %v4220_v31 = vpop.f32.mrb[47].mxu1 }
 0x15d   : > { %v5727_v32 = vadd.f32 %v4218_v28, %v2768_v12  ;;  %v2771_v39 = vadd.f32 %v4157_v30, %v5653_v16  ;;  %v4221_v5 = vadd.f32 %v4220_v31, %v4219_v29 }
 0x15f   : > { %v5730_v33 = vadd.f32 %v4221_v5, %v2771_v39  ;;  %v4158_v34 = vpop.f32.mrb[48].mxu0 }
 0x160   : > { %v4159_v35 = vpop.f32.mrb[49].mxu0 }
 0x161   : > { %v4222_v37 = vpop.f32.mrb[48].mxu1  ;;  %v4160_v42 = vadd.f32 %v4159_v35, %v4158_v34  ;;  %v4161_v18 = vpop.f32.mrb[50].mxu0 }
 0x162   : > { %v4223_v46 = vpop.f32.mrb[49].mxu1  ;;  %v4162_v47 = vpop.f32.mrb[51].mxu0 }
 0x163   : > { %v2776_v41 = vadd.f32 %v4160_v42, %v5670_v11  ;;  %v4224_v50 = vadd.f32 %v4223_v46, %v4222_v37  ;;  %v4225_v51 = vpop.f32.mrb[50].mxu1  ;;  %v4163_v53 = vadd.f32 %v4162_v47, %v4161_v18 }
 0x164   : > { %v4226_v55 = vpop.f32.mrb[51].mxu1 }
 0x165   : > { %v5733_v17 = vadd.f32 %v4224_v50, %v2776_v41  ;;  %v2779_v16 = vadd.f32 %v4163_v53, %v5677_v20  ;;  %v4227_v56 = vadd.f32 %v4226_v55, %v4225_v51 }
 0x167   : > { %v5736_v57 = vadd.f32 %v4227_v56, %v2779_v16  ;;  %v4164_v58 = vpop.f32.mrb[52].mxu0 }
 0x168   : > { %v4165_v60 = vpop.f32.mrb[53].mxu0 }
 0x169   : > { %v4228_v21 = vpop.f32.mrb[52].mxu1  ;;  %v4166_v62 = vadd.f32 %v4165_v60, %v4164_v58  ;;  %v4167_v63 = vpop.f32.mrb[54].mxu0 }
 0x16a   : > { %v4229_v36 = vpop.f32.mrb[53].mxu1  ;;  %v4168_v1 = vpop.f32.mrb[55].mxu0 }
 0x16b   : > { %v2784_v11 = vadd.f32 %v4166_v62, %v5689_v49  ;;  %v4230_v3 = vadd.f32 %v4229_v36, %v4228_v21  ;;  %v4231_v4 = vpop.f32.mrb[54].mxu1  ;;  %v4169_v6 = vadd.f32 %v4168_v1, %v4167_v63 }
 0x16c   : > { %v4232_v7 = vpop.f32.mrb[55].mxu1 }
 0x16d   : > { %v5739_v48 = vadd.f32 %v4230_v3, %v2784_v11  ;;  %v2787_v20 = vadd.f32 %v4169_v6, %v5695_v54  ;;  %v4233_v38 = vadd.f32 %v4232_v7, %v4231_v4 }
 0x16f   : > { %v5742_v8 = vadd.f32 %v4233_v38, %v2787_v20  ;;  %v4170_v9 = vpop.f32.mrb[56].mxu0 }
 0x170   : > { %v4171_v10 = vpop.f32.mrb[57].mxu0 }
 0x171   : > { %v4234_v52 = vpop.f32.mrb[56].mxu1  ;;  %v4172_v59 = vadd.f32 %v4171_v10, %v4170_v9  ;;  %v4173_v2 = vpop.f32.mrb[58].mxu0 }
 0x172   : > { %v4235_v19 = vpop.f32.mrb[57].mxu1  ;;  %v4174_v22 = vpop.f32.mrb[59].mxu0 }
 0x173   : > { %v2792_v49 = vadd.f32 %v4172_v59, %v5699_v26  ;;  %v4236_v24 = vadd.f32 %v4235_v19, %v4234_v52  ;;  %v4237_v44 = vpop.f32.mrb[58].mxu1  ;;  %v4175_v25 = vadd.f32 %v4174_v22, %v4173_v2 }
 0x174   : > { %v4238_v27 = vpop.f32.mrb[59].mxu1 }
 0x175   : > { %v5745_v12 = vadd.f32 %v4236_v24, %v2792_v49  ;;  %v2795_v54 = vadd.f32 %v4175_v25, %v5702_v43  ;;  %v4239_v28 = vadd.f32 %v4238_v27, %v4237_v44 }
 0x177   : > { %v5748_v29 = vadd.f32 %v4239_v28, %v2795_v54  ;;  %v4176_v30 = vpop.f32.mrb[60].mxu0 }
 0x178   : > { %v4177_v31 = vpop.f32.mrb[61].mxu0 }
 0x179   : > { %v4240_v39 = vpop.f32.mrb[60].mxu1  ;;  %v4178_v5 = vadd.f32 %v4177_v31, %v4176_v30  ;;  %v4179_v34 = vpop.f32.mrb[62].mxu0 }
 0x17a   : > { %v4241_v35 = vpop.f32.mrb[61].mxu1  ;;  %v4180_v37 = vpop.f32.mrb[63].mxu0 }
 0x17b   : > { %v2800_v26 = vadd.f32 %v4178_v5, %v5704_v23  ;;  %v4242_v42 = vadd.f32 %v4241_v35, %v4240_v39  ;;  %v4243_v18 = vpop.f32.mrb[62].mxu1  ;;  %v4181_v46 = vadd.f32 %v4180_v37, %v4179_v34 }
 0x17c   : > { %v4244_v47 = vpop.f32.mrb[63].mxu1 }
 0x17d   : > { %v5751_v41 = vadd.f32 %v4242_v42, %v2800_v26  ;;  %v2803_v43 = vadd.f32 %v4181_v46, %v5706_v0  ;;  %v4245_v50 = vadd.f32 %v4244_v47, %v4243_v18 }
 0x17f   : > { %v5754_v51 = vadd.f32 %v4245_v50, %v2803_v43  ;;  %v4262_v53 = vpop.f32.mrb[64].mxu0 }
 0x180   : > { %v4263_v55 = vpop.f32.mrb[65].mxu0 }
 0x181   : > { %v4326_v16 = vpop.f32.mrb[64].mxu1  ;;  %v4264_v56 = vadd.f32 %v4263_v55, %v4262_v53  ;;  %v4265_v58 = vpop.f32.mrb[66].mxu0 }
 0x182   : > { %v4327_v60 = vpop.f32.mrb[65].mxu1  ;;  %v4266_v21 = vpop.f32.mrb[67].mxu0 }
 0x183   : > { %v2938_v23 = vadd.f32 %v4264_v56, %v5709_v14  ;;  %v4328_v62 = vadd.f32 %v4327_v60, %v4326_v16  ;;  %v4329_v63 = vpop.f32.mrb[66].mxu1  ;;  %v4267_v36 = vadd.f32 %v4266_v21, %v4265_v58 }
 0x184   : > { %v4330_v1 = vpop.f32.mrb[67].mxu1 }
 0x185   : > { %v5757_v11 = vadd.f32 %v4328_v62, %v2938_v23  ;;  %v2941_v0 = vadd.f32 %v4267_v36, %v5712_v45  ;;  %v4331_v3 = vadd.f32 %v4330_v1, %v4329_v63 }
 0x187   : > { %v5760_v4 = vadd.f32 %v4331_v3, %v2941_v0  ;;  %v4268_v6 = vpop.f32.mrb[68].mxu0 }
 0x188   : > { %v4269_v7 = vpop.f32.mrb[69].mxu0 }
 0x189   : > { %v4332_v20 = vpop.f32.mrb[68].mxu1  ;;  %v4270_v38 = vadd.f32 %v4269_v7, %v4268_v6  ;;  %v4271_v9 = vpop.f32.mrb[70].mxu0 }
 0x18a   : > { %v4333_v10 = vpop.f32.mrb[69].mxu1  ;;  %v4272_v52 = vpop.f32.mrb[71].mxu0 }
 0x18b   : > { %v2946_v14 = vadd.f32 %v4270_v38, %v5715_v61  ;;  %v4334_v59 = vadd.f32 %v4333_v10, %v4332_v20  ;;  %v4335_v2 = vpop.f32.mrb[70].mxu1  ;;  %v4273_v19 = vadd.f32 %v4272_v52, %v4271_v9 }
 0x18c   : > { %v4336_v22 = vpop.f32.mrb[71].mxu1 }
 0x18d   : > { %v5763_v49 = vadd.f32 %v4334_v59, %v2946_v14  ;;  %v2949_v45 = vadd.f32 %v4273_v19, %v5718_v40  ;;  %v4337_v24 = vadd.f32 %v4336_v22, %v4335_v2 }
 0x18f   : > { %v5766_v44 = vadd.f32 %v4337_v24, %v2949_v45  ;;  %v4274_v25 = vpop.f32.mrb[72].mxu0 }
 0x190   : > { %v4275_v27 = vpop.f32.mrb[73].mxu0 }
 0x191   : > { %v4338_v54 = vpop.f32.mrb[72].mxu1  ;;  %v4276_v28 = vadd.f32 %v4275_v27, %v4274_v25  ;;  %v4277_v30 = vpop.f32.mrb[74].mxu0 }
 0x192   : > { %v4339_v31 = vpop.f32.mrb[73].mxu1  ;;  %v4278_v39 = vpop.f32.mrb[75].mxu0 }
 0x193   : > { %v2954_v61 = vadd.f32 %v4276_v28, %v5721_v13  ;;  %v4340_v5 = vadd.f32 %v4339_v31, %v4338_v54  ;;  %v4341_v34 = vpop.f32.mrb[74].mxu1  ;;  %v4279_v35 = vadd.f32 %v4278_v39, %v4277_v30 }
 0x194   : > { %v4342_v37 = vpop.f32.mrb[75].mxu1 }
 0x195   : > { %v5769_v26 = vadd.f32 %v4340_v5, %v2954_v61  ;;  %v2957_v40 = vadd.f32 %v4279_v35, %v5724_v15  ;;  %v4343_v42 = vadd.f32 %v4342_v37, %v4341_v34 }
 0x197   : > { %v5772_v18 = vadd.f32 %v4343_v42, %v2957_v40  ;;  %v4280_v46 = vpop.f32.mrb[76].mxu0 }
 0x198   : > { %v4281_v47 = vpop.f32.mrb[77].mxu0 }
 0x199   : > { %v4344_v43 = vpop.f32.mrb[76].mxu1  ;;  %v4282_v50 = vadd.f32 %v4281_v47, %v4280_v46  ;;  %v4283_v53 = vpop.f32.mrb[78].mxu0 }
 0x19a   : > { %v4345_v55 = vpop.f32.mrb[77].mxu1  ;;  %v4284_v16 = vpop.f32.mrb[79].mxu0 }
 0x19b   : > { %v2962_v13 = vadd.f32 %v4282_v50, %v5727_v32  ;;  %v4346_v56 = vadd.f32 %v4345_v55, %v4344_v43  ;;  %v4347_v58 = vpop.f32.mrb[78].mxu1  ;;  %v4285_v60 = vadd.f32 %v4284_v16, %v4283_v53 }
 0x19c   : > { %v4348_v21 = vpop.f32.mrb[79].mxu1 }
 0x19d   : > { %v5775_v23 = vadd.f32 %v4346_v56, %v2962_v13  ;;  %v2965_v15 = vadd.f32 %v4285_v60, %v5730_v33  ;;  %v4349_v62 = vadd.f32 %v4348_v21, %v4347_v58 }
 0x19f   : > { %v5778_v63 = vadd.f32 %v4349_v62, %v2965_v15  ;;  %v4286_v36 = vpop.f32.mrb[80].mxu0 }
 0x1a0   : > { %v4287_v1 = vpop.f32.mrb[81].mxu0 }
 0x1a1   : > { %v4350_v0 = vpop.f32.mrb[80].mxu1  ;;  %v4288_v3 = vadd.f32 %v4287_v1, %v4286_v36  ;;  %v4289_v6 = vpop.f32.mrb[82].mxu0 }
 0x1a2   : > { %v4351_v7 = vpop.f32.mrb[81].mxu1  ;;  %v4290_v20 = vpop.f32.mrb[83].mxu0 }
 0x1a3   : > { %v2970_v32 = vadd.f32 %v4288_v3, %v5733_v17  ;;  %v4352_v38 = vadd.f32 %v4351_v7, %v4350_v0  ;;  %v4353_v9 = vpop.f32.mrb[82].mxu1  ;;  %v4291_v10 = vadd.f32 %v4290_v20, %v4289_v6 }
 0x1a4   : > { %v4354_v52 = vpop.f32.mrb[83].mxu1 }
 0x1a5   : > { %v5781_v14 = vadd.f32 %v4352_v38, %v2970_v32  ;;  %v2973_v33 = vadd.f32 %v4291_v10, %v5736_v57  ;;  %v4355_v59 = vadd.f32 %v4354_v52, %v4353_v9 }
 0x1a7   : > { %v5784_v2 = vadd.f32 %v4355_v59, %v2973_v33  ;;  %v4292_v19 = vpop.f32.mrb[84].mxu0 }
 0x1a8   : > { %v4293_v22 = vpop.f32.mrb[85].mxu0 }
 0x1a9   : > { %v4356_v45 = vpop.f32.mrb[84].mxu1  ;;  %v4294_v24 = vadd.f32 %v4293_v22, %v4292_v19  ;;  %v4295_v25 = vpop.f32.mrb[86].mxu0 }
 0x1aa   : > { %v4357_v27 = vpop.f32.mrb[85].mxu1  ;;  %v4296_v54 = vpop.f32.mrb[87].mxu0 }
 0x1ab   : > { %v2978_v17 = vadd.f32 %v4294_v24, %v5739_v48  ;;  %v4358_v28 = vadd.f32 %v4357_v27, %v4356_v45  ;;  %v4359_v30 = vpop.f32.mrb[86].mxu1  ;;  %v4297_v31 = vadd.f32 %v4296_v54, %v4295_v25 }
 0x1ac   : > { %v4360_v39 = vpop.f32.mrb[87].mxu1 }
 0x1ad   : > { %v5787_v61 = vadd.f32 %v4358_v28, %v2978_v17  ;;  %v2981_v57 = vadd.f32 %v4297_v31, %v5742_v8  ;;  %v4361_v5 = vadd.f32 %v4360_v39, %v4359_v30 }
 0x1af   : > { %v5790_v34 = vadd.f32 %v4361_v5, %v2981_v57  ;;  %v4298_v35 = vpop.f32.mrb[88].mxu0 }
 0x1b0   : > { %v4299_v37 = vpop.f32.mrb[89].mxu0 }
 0x1b1   : > { %v4362_v40 = vpop.f32.mrb[88].mxu1  ;;  %v4300_v42 = vadd.f32 %v4299_v37, %v4298_v35  ;;  %v4301_v46 = vpop.f32.mrb[90].mxu0 }
 0x1b2   : > { %v4363_v47 = vpop.f32.mrb[89].mxu1  ;;  %v4302_v43 = vpop.f32.mrb[91].mxu0 }
 0x1b3   : > { %v2986_v48 = vadd.f32 %v4300_v42, %v5745_v12  ;;  %v4364_v50 = vadd.f32 %v4363_v47, %v4362_v40  ;;  %v4365_v53 = vpop.f32.mrb[90].mxu1  ;;  %v4303_v55 = vadd.f32 %v4302_v43, %v4301_v46 }
 0x1b4   : > { %v4366_v16 = vpop.f32.mrb[91].mxu1 }
 0x1b5   : > { %v5793_v13 = vadd.f32 %v4364_v50, %v2986_v48  ;;  %v2989_v8 = vadd.f32 %v4303_v55, %v5748_v29  ;;  %v4367_v56 = vadd.f32 %v4366_v16, %v4365_v53 }
 0x1b7   : > { %v5796_v58 = vadd.f32 %v4367_v56, %v2989_v8  ;;  %v4304_v60 = vpop.f32.mrb[92].mxu0 }
 0x1b8   : > { %v4305_v21 = vpop.f32.mrb[93].mxu0 }
 0x1b9   : > { %v4368_v15 = vpop.f32.mrb[92].mxu1  ;;  %v4306_v62 = vadd.f32 %v4305_v21, %v4304_v60  ;;  %v4307_v36 = vpop.f32.mrb[94].mxu0 }
 0x1ba   : > { %v4369_v1 = vpop.f32.mrb[93].mxu1  ;;  %v4308_v0 = vpop.f32.mrb[95].mxu0 }
 0x1bb   : > { %v2994_v12 = vadd.f32 %v4306_v62, %v5751_v41  ;;  %v4370_v3 = vadd.f32 %v4369_v1, %v4368_v15  ;;  %v4371_v6 = vpop.f32.mrb[94].mxu1  ;;  %v4309_v7 = vadd.f32 %v4308_v0, %v4307_v36 }
 0x1bc   : > { %v4372_v20 = vpop.f32.mrb[95].mxu1 }
 0x1bd   : > { %v5799_v32 = vadd.f32 %v4370_v3, %v2994_v12  ;;  %v2997_v29 = vadd.f32 %v4309_v7, %v5754_v51  ;;  %v4373_v38 = vadd.f32 %v4372_v20, %v4371_v6 }
 0x1bf   : > { %v5802_v9 = vadd.f32 %v4373_v38, %v2997_v29  ;;  %v4390_v10 = vpop.f32.mrb[96].mxu0 }
 0x1c0   : > { %v4391_v52 = vpop.f32.mrb[97].mxu0 }
 0x1c1   : > { %v4454_v33 = vpop.f32.mrb[96].mxu1  ;;  %v4392_v59 = vadd.f32 %v4391_v52, %v4390_v10  ;;  %v4393_v19 = vpop.f32.mrb[98].mxu0 }
 0x1c2   : > { %v4455_v22 = vpop.f32.mrb[97].mxu1  ;;  %v4394_v45 = vpop.f32.mrb[99].mxu0 }
 0x1c3   : > { %v3132_v41 = vadd.f32 %v4392_v59, %v5757_v11  ;;  %v4456_v24 = vadd.f32 %v4455_v22, %v4454_v33  ;;  %v4457_v25 = vpop.f32.mrb[98].mxu1  ;;  %v4395_v27 = vadd.f32 %v4394_v45, %v4393_v19 }
 0x1c4   : > { %v4458_v54 = vpop.f32.mrb[99].mxu1 }
 0x1c5   : > { %v3135_v17 = vadd.f32 %v4395_v27, %v5760_v4  ;;  %v4459_v28 = vadd.f32 %v4458_v54, %v4457_v25  ;;  %v5806_v51 = vadd.f32 %v4456_v24, %v3132_v41 }
 0x1c7   : > { %v4396_v30 = vpop.f32.mrb[100].mxu0  ;;  %v5808_v31 = vadd.f32 %v4459_v28, %v3135_v17 }
 0x1c8   : > { %v4397_v39 = vpop.f32.mrb[101].mxu0 }
 0x1c9   : > { %v4460_v57 = vpop.f32.mrb[100].mxu1  ;;  %v4398_v5 = vadd.f32 %v4397_v39, %v4396_v30  ;;  %v4399_v35 = vpop.f32.mrb[102].mxu0 }
 0x1ca   : > { %v4461_v37 = vpop.f32.mrb[101].mxu1  ;;  %v4400_v40 = vpop.f32.mrb[103].mxu0 }
 0x1cb   : > { %v3140_v11 = vadd.f32 %v4398_v5, %v5763_v49  ;;  %v4462_v42 = vadd.f32 %v4461_v37, %v4460_v57  ;;  %v4463_v46 = vpop.f32.mrb[102].mxu1  ;;  %v4401_v47 = vadd.f32 %v4400_v40, %v4399_v35 }
 0x1cc   : > { %v4464_v43 = vpop.f32.mrb[103].mxu1 }
 0x1cd   : > { %v3143_v4 = vadd.f32 %v4401_v47, %v5766_v44  ;;  %v4465_v48 = vadd.f32 %v4464_v43, %v4463_v46  ;;  %v5812_v50 = vadd.f32 %v4462_v42, %v3140_v11 }
 0x1cf   : > { %v4402_v53 = vpop.f32.mrb[104].mxu0  ;;  %v5814_v55 = vadd.f32 %v4465_v48, %v3143_v4 }
 0x1d0   : > { %v4403_v16 = vpop.f32.mrb[105].mxu0 }
 0x1d1   : > { %v4466_v8 = vpop.f32.mrb[104].mxu1  ;;  %v4404_v56 = vadd.f32 %v4403_v16, %v4402_v53  ;;  %v4405_v60 = vpop.f32.mrb[106].mxu0 }
 0x1d2   : > { %v4467_v21 = vpop.f32.mrb[105].mxu1  ;;  %v4406_v15 = vpop.f32.mrb[107].mxu0 }
 0x1d3   : > { %v3148_v49 = vadd.f32 %v4404_v56, %v5769_v26  ;;  %v4468_v62 = vadd.f32 %v4467_v21, %v4466_v8  ;;  %v4469_v36 = vpop.f32.mrb[106].mxu1  ;;  %v4407_v1 = vadd.f32 %v4406_v15, %v4405_v60 }
 0x1d4   : > { %v4470_v0 = vpop.f32.mrb[107].mxu1 }
 0x1d5   : > { %v3151_v44 = vadd.f32 %v4407_v1, %v5772_v18  ;;  %v4471_v12 = vadd.f32 %v4470_v0, %v4469_v36  ;;  %v5818_v3 = vadd.f32 %v4468_v62, %v3148_v49 }
 0x1d7   : > { %v4408_v6 = vpop.f32.mrb[108].mxu0  ;;  %v5820_v7 = vadd.f32 %v4471_v12, %v3151_v44 }
 0x1d8   : > { %v4409_v20 = vpop.f32.mrb[109].mxu0 }
 0x1d9   : > { %v4472_v29 = vpop.f32.mrb[108].mxu1  ;;  %v4410_v38 = vadd.f32 %v4409_v20, %v4408_v6  ;;  %v4411_v10 = vpop.f32.mrb[110].mxu0 }
 0x1da   : > { %v4473_v52 = vpop.f32.mrb[109].mxu1  ;;  %v4412_v33 = vpop.f32.mrb[111].mxu0 }
 0x1db   : > { %v3156_v26 = vadd.f32 %v4410_v38, %v5775_v23  ;;  %v4474_v59 = vadd.f32 %v4473_v52, %v4472_v29  ;;  %v4475_v19 = vpop.f32.mrb[110].mxu1  ;;  %v4413_v22 = vadd.f32 %v4412_v33, %v4411_v10 }
 0x1dc   : > { %v4476_v45 = vpop.f32.mrb[111].mxu1 }
 0x1dd   : > { %v3159_v18 = vadd.f32 %v4413_v22, %v5778_v63  ;;  %v4477_v41 = vadd.f32 %v4476_v45, %v4475_v19  ;;  %v5824_v24 = vadd.f32 %v4474_v59, %v3156_v26 }
 0x1df   : > { %v4414_v25 = vpop.f32.mrb[112].mxu0  ;;  %v5826_v27 = vadd.f32 %v4477_v41, %v3159_v18 }
 0x1e0   : > { %v4415_v54 = vpop.f32.mrb[113].mxu0 }
 0x1e1   : > { %v4478_v17 = vpop.f32.mrb[112].mxu1  ;;  %v4416_v28 = vadd.f32 %v4415_v54, %v4414_v25  ;;  %v4417_v30 = vpop.f32.mrb[114].mxu0 }
 0x1e2   : > { %v4479_v39 = vpop.f32.mrb[113].mxu1  ;;  %v4418_v57 = vpop.f32.mrb[115].mxu0 }
 0x1e3   : > { %v3164_v23 = vadd.f32 %v4416_v28, %v5781_v14  ;;  %v4480_v5 = vadd.f32 %v4479_v39, %v4478_v17  ;;  %v4481_v35 = vpop.f32.mrb[114].mxu1  ;;  %v4419_v37 = vadd.f32 %v4418_v57, %v4417_v30 }
 0x1e4   : > { %v4482_v40 = vpop.f32.mrb[115].mxu1 }
 0x1e5   : > { %v3167_v63 = vadd.f32 %v4419_v37, %v5784_v2  ;;  %v4483_v11 = vadd.f32 %v4482_v40, %v4481_v35  ;;  %v5830_v42 = vadd.f32 %v4480_v5, %v3164_v23 }
 0x1e7   : > { %v4420_v46 = vpop.f32.mrb[116].mxu0  ;;  %v5832_v47 = vadd.f32 %v4483_v11, %v3167_v63 }
 0x1e8   : > { %v4421_v43 = vpop.f32.mrb[117].mxu0 }
 0x1e9   : > { %v4484_v4 = vpop.f32.mrb[116].mxu1  ;;  %v4422_v48 = vadd.f32 %v4421_v43, %v4420_v46  ;;  %v4423_v53 = vpop.f32.mrb[118].mxu0 }
 0x1ea   : > { %v4485_v16 = vpop.f32.mrb[117].mxu1  ;;  %v4424_v8 = vpop.f32.mrb[119].mxu0 }
 0x1eb   : > { %v3172_v14 = vadd.f32 %v4422_v48, %v5787_v61  ;;  %v4486_v56 = vadd.f32 %v4485_v16, %v4484_v4  ;;  %v4487_v60 = vpop.f32.mrb[118].mxu1  ;;  %v4425_v21 = vadd.f32 %v4424_v8, %v4423_v53 }
 0x1ec   : > { %v4488_v15 = vpop.f32.mrb[119].mxu1 }
 0x1ed   : > { %v3175_v2 = vadd.f32 %v4425_v21, %v5790_v34  ;;  %v4489_v49 = vadd.f32 %v4488_v15, %v4487_v60  ;;  %v3269_v62 = vadd.f32 %v4486_v56, %v3172_v14 }
 0x1ef   : > { %v4426_v36 = vpop.f32.mrb[120].mxu0  ;;  %v3272_v1 = vadd.f32 %v4489_v49, %v3175_v2 }
 0x1f0   : > { %v4427_v0 = vpop.f32.mrb[121].mxu0 }
 0x1f1   : > { %v4490_v44 = vpop.f32.mrb[120].mxu1  ;;  %v4428_v12 = vadd.f32 %v4427_v0, %v4426_v36  ;;  %v4429_v6 = vpop.f32.mrb[122].mxu0 }
 0x1f2   : > { %v4491_v20 = vpop.f32.mrb[121].mxu1  ;;  %v4430_v29 = vpop.f32.mrb[123].mxu0 }
 0x1f3   : > { %v3180_v38 = vadd.f32 %v4428_v12, %v5793_v13  ;;  %v4492_v61 = vadd.f32 %v4491_v20, %v4490_v44  ;;  %v4493_v10 = vpop.f32.mrb[122].mxu1  ;;  %v4431_v52 = vadd.f32 %v4430_v29, %v4429_v6 }
 0x1f4   : > { %v4494_v33 = vpop.f32.mrb[123].mxu1 }
 0x1f5   : > { %v3183_v26 = vadd.f32 %v4431_v52, %v5796_v58  ;;  %v4495_v34 = vadd.f32 %v4494_v33, %v4493_v10  ;;  %v3277_v59 = vadd.f32 %v4492_v61, %v3180_v38 }
 0x1f7   : > { %v4432_v19 = vpop.f32.mrb[124].mxu0  ;;  %v5838_v22 = vadd.f32 %v4495_v34, %v3183_v26 }
 0x1f8   : > { %v4433_v45 = vpop.f32.mrb[125].mxu0 }
 0x1f9   : > { %v4496_v18 = vpop.f32.mrb[124].mxu1  ;;  %v4434_v41 = vadd.f32 %v4433_v45, %v4432_v19  ;;  %v4435_v25 = vpop.f32.mrb[126].mxu0 }
 0x1fa   : > { %v4497_v54 = vpop.f32.mrb[125].mxu1  ;;  %v4436_v17 = vpop.f32.mrb[127].mxu0 }
 0x1fb   : > { %v3188_v13 = vadd.f32 %v4434_v41, %v5799_v32  ;;  %v4498_v28 = vadd.f32 %v4497_v54, %v4496_v18  ;;  %v4499_v30 = vpop.f32.mrb[126].mxu1  ;;  %v4437_v39 = vadd.f32 %v4436_v17, %v4435_v25 }
 0x1fc   : > { %v4500_v57 = vpop.f32.mrb[127].mxu1 }
 0x1fd   : > { %v3191_v58 = vadd.f32 %v4437_v39, %v5802_v9  ;;  %v4501_v23 = vadd.f32 %v4500_v57, %v4499_v30  ;;  %v3285_v5 = vadd.f32 %v4498_v28, %v3188_v13 }
 0x1ff   : > { %v4515_v35 = vpop.f32.mrb[128].mxu0  ;;  %v3288_v37 = vadd.f32 %v4501_v23, %v3191_v58 }
 0x200   : > { %v3334_v40 = vadd.f32 %v4515_v35, %v5812_v50  ;;  %v3325_v63 = vpop.f32.mrb[129].mxu0 }
 0x201   : > { %v4523_v11 = vpop.f32.mrb[128].mxu1  ;;  %v3326_v46 = vadd.f32 %v3325_v63, %v5806_v51  ;;  %v4516_v43 = vpop.f32.mrb[130].mxu0 }
 0x202   : > { %3391 = vst.msk [vmem:[%s5845_s12 + $0x10] sm:$0xff] %vm3388_vm1, %v3334_v40  ;;  %v3366_v32 = vadd.f32 %v4523_v11, %v3269_v62  ;;  %v3357_v9 = vpop.f32.mrb[129].mxu1  ;;  %v3337_v50 = vadd.f32 %v4516_v43, %v5814_v55  ;;  %v3328_v4 = vpop.f32.mrb[131].mxu0 }
 0x203   : > { %3389 = vst.msk [vmem:[%s5845_s12] sm:$0xff] %vm3388_vm1, %v3326_v46  ;;  %v3358_v51 = vadd.f32 %v3357_v9, %v5830_v42  ;;  %v4524_v48 = vpop.f32.mrb[130].mxu1  ;;  %v3329_v53 = vadd.f32 %v3328_v4, %v5808_v31 }
 0x204   : > { %3399 = vst.msk [vmem:[%s5845_s12 + $0x50] sm:$0xff] %vm3388_vm1, %v3366_v32  ;;  %3392 = vst.msk [vmem:[%s5845_s12 + $0x18] sm:$0xff] %vm3388_vm1, %v3337_v50  ;;  %v3369_v16 = vadd.f32 %v4524_v48, %v3272_v1  ;;  %v3360_v8 = vpop.f32.mrb[131].mxu1 }
 0x205   : > { %3397 = vst.msk [vmem:[%s5845_s12 + $0x40] sm:$0xff] %vm3388_vm1, %v3358_v51  ;;  %3390 = vst.msk [vmem:[%s5845_s12 + $0x8] sm:$0xff] %vm3388_vm1, %v3329_v53  ;;  %v3361_v55 = vadd.f32 %v3360_v8, %v5832_v47 }
 0x206   : > { %3400 = vst.msk [vmem:[%s5845_s12 + $0x58] sm:$0xff] %vm3388_vm1, %v3369_v16 }
 0x207   : > { %3398 = vst.msk [vmem:[%s5845_s12 + $0x48] sm:$0xff] %vm3388_vm1, %v3361_v55  ;;  %v4519_v31 = vpop.f32.mrb[132].mxu0 }
 0x208   : > { %v3350_v42 = vadd.f32 %v4519_v31, %v5824_v24  ;;  %v3341_v14 = vpop.f32.mrb[133].mxu0 }
 0x209   : > { %v4527_v56 = vpop.f32.mrb[132].mxu1  ;;  %v3342_v60 = vadd.f32 %v3341_v14, %v5818_v3  ;;  %v4520_v21 = vpop.f32.mrb[134].mxu0  ;;  %3411 = sbr.rel (!%p4886_p4) target bundleno = 577 (0x241), region = 36 }
 0x20a   : > { %3395 = vst.msk [vmem:[%s5845_s12 + $0x30] sm:$0xff] %vm3388_vm1, %v3350_v42  ;;  %v3382_v47 = vadd.f32 %v4527_v56, %v3285_v5  ;;  %v3373_v15 = vpop.f32.mrb[133].mxu1  ;;  %v3353_v2 = vadd.f32 %v4520_v21, %v5826_v27  ;;  %v3344_v49 = vpop.f32.mrb[135].mxu0 }
 0x20b   : > { %3393 = vst.msk [vmem:[%s5845_s12 + $0x20] sm:$0xff] %vm3388_vm1, %v3342_v60  ;;  %v3374_v62 = vadd.f32 %v3373_v15, %v3277_v59  ;;  %v4528_v24 = vpop.f32.mrb[134].mxu1  ;;  %v3345_v36 = vadd.f32 %v3344_v49, %v5820_v7 }
 0x20c   : > { %3403 = vst.msk [vmem:[%s5845_s12 + $0x70] sm:$0xff] %vm3388_vm1, %v3382_v47  ;;  %3396 = vst.msk [vmem:[%s5845_s12 + $0x38] sm:$0xff] %vm3388_vm1, %v3353_v2  ;;  %v3385_v3 = vadd.f32 %v4528_v24, %v3288_v37  ;;  %v3376_v1 = vpop.f32.mrb[135].mxu1 }
 0x20d   : > { %3401 = vst.msk [vmem:[%s5845_s12 + $0x60] sm:$0xff] %vm3388_vm1, %v3374_v62  ;;  %3394 = vst.msk [vmem:[%s5845_s12 + $0x28] sm:$0xff] %vm3388_vm1, %v3345_v36  ;;  %v3377_v0 = vadd.f32 %v3376_v1, %v5838_v22 }
 0x20e   : > { %3404 = vst.msk [vmem:[%s5845_s12 + $0x78] sm:$0xff] %vm3388_vm1, %v3385_v3 }
 0x20f   : > { %3402 = vst.msk [vmem:[%s5845_s12 + $0x68] sm:$0xff] %vm3388_vm1, %v3377_v0 }
 0x210   : > { %s6000_s17 = smov (!%p3414_p8, %s3413_s17), 16 }
 0x211   : > { %s3972_s24 = sshll.u32 %s6000_s17, 7 }
 0x212   : > { %p3975_p9 = scmp.eq.s32.totalorder %s3972_s24, 0 }
 0x213   : > { %s5901_s25 = sshrl.u32 (!%p3975_p9), %s6000_s17, 4 }
 0x214   : > { %3422 = sbr.rel (%p3975_p9) target bundleno = 577 (0x241), region = 40  ;;  %p3976_p10 = scmp.le.s32.totalorder (!%p3975_p9), %s5901_s25, 0 }
 0x21b   : > { %3636 = sbr.rel (%p3976_p10) target bundleno = 556 (0x22c), region = 116  ;;  %s5993_s15 = smov (!%p3976_p10), %s5895_s23 }
 0x21c   : > { %s5994_s20 = smov (!%p3976_p10), %s5845_s12  ;;  %s5910_s14 = smov (!%p3976_p10), 0  }
 0x21d   : > { %s5912_s26 = smov (!%p3976_p10), 0  }
 0x222 LB: >> { %v3514_v7 = vld [vmem:[%s4814_s20] sm:$0xff]  ;;  %v3516_v27 = vld [vmem:[%s4814_s20 + $0x8] sm:$0xff]  ;;  %v3518_v44 = vld [vmem:[%s4814_s20 + $0x10] sm:$0xff]  ;;  %s3546_s27 = sadd.s32 1, %s4818_s14  ;;  %s3508_s26 = sadd.s32 1, %s4822_s26   ;;  %s4822_s26 = sphi %s5912_s26, %s3508_s26   ;;  %s4818_s14 = sphi %s5910_s14, %s5995_s14   ;;  %s4814_s20 = sphi %s5994_s20, %s3551_s20   ;;  %s4810_s15 = sphi %s5993_s15, %s3552_s15  }
 0x223   : >> { %3515 = vst [vmem:[%s4810_s15] sm:$0xff] %v3514_v7  ;;  %3517 = vst [vmem:[%s4810_s15 + $0x8] sm:$0xff] %v3516_v27  ;;  %v3520_v12 = vld [vmem:[%s4814_s20 + $0x18] sm:$0xff]  ;;  %v3522_v6 = vld [vmem:[%s4814_s20 + $0x20] sm:$0xff]  ;;  %p3547_p11 = scmp.ge.s32.totalorder %s3546_s27, %s5901_s25  ;;  %p3507_p12 = scmp.ge.s32.totalorder %s3508_s26, %s5901_s25 }
 0x224   : >> { %3519 = vst [vmem:[%s4810_s15 + $0x10] sm:$0xff] %v3518_v44  ;;  %v3524_v20 = vld [vmem:[%s4814_s20 + $0x28] sm:$0xff]  ;;  %3521 = vst [vmem:[%s4810_s15 + $0x18] sm:$0xff] %v3520_v12  ;;  %v3526_v29 = vld [vmem:[%s4814_s20 + $0x30] sm:$0xff] }
 0x225   : >> { %3523 = vst [vmem:[%s4810_s15 + $0x20] sm:$0xff] %v3522_v6  ;;  %3525 = vst [vmem:[%s4810_s15 + $0x28] sm:$0xff] %v3524_v20  ;;  %v3528_v38 = vld [vmem:[%s4814_s20 + $0x38] sm:$0xff]  ;;  %v3530_v61 = vld [vmem:[%s4814_s20 + $0x40] sm:$0xff]  ;;  %s6002_s27 = smov (%p3547_p11, %s3546_s27), 0  ;;  %3510 = sbr.rel (!%p3507_p12) target bundleno = 546 (0x222), region = 122 }
 0x226   : >> { %3527 = vst [vmem:[%s4810_s15 + $0x30] sm:$0xff] %v3526_v29  ;;  %3529 = vst [vmem:[%s4810_s15 + $0x38] sm:$0xff] %v3528_v38  ;;  %v3532_v10 = vld [vmem:[%s4814_s20 + $0x48] sm:$0xff]  ;;  %v3534_v52 = vld [vmem:[%s4814_s20 + $0x50] sm:$0xff]  ;;  %s3977_s28 = sshll.u32 %s6002_s27, 7  ;;  %s5995_s14 = smov %s6002_s27 }
 0x227   : >> { %3531 = vst [vmem:[%s4810_s15 + $0x40] sm:$0xff] %v3530_v61  ;;  %v3536_v33 = vld [vmem:[%s4814_s20 + $0x58] sm:$0xff]  ;;  %3533 = vst [vmem:[%s4810_s15 + $0x48] sm:$0xff] %v3532_v10  ;;  %v3538_v26 = vld [vmem:[%s4814_s20 + $0x60] sm:$0xff] }
 0x228   : >> { %3535 = vst [vmem:[%s4810_s15 + $0x50] sm:$0xff] %v3534_v52  ;;  %3537 = vst [vmem:[%s4810_s15 + $0x58] sm:$0xff] %v3536_v33  ;;  %v3540_v34 = vld [vmem:[%s4814_s20 + $0x68] sm:$0xff]  ;;  %v3542_v59 = vld [vmem:[%s4814_s20 + $0x70] sm:$0xff] }
 0x229   : >> { %3539 = vst [vmem:[%s4810_s15 + $0x60] sm:$0xff] %v3538_v26  ;;  %3541 = vst [vmem:[%s4810_s15 + $0x68] sm:$0xff] %v3540_v34  ;;  %v3544_v19 = vld [vmem:[%s4814_s20 + $0x78] sm:$0xff]  ;;  %s3551_s20 = scalar_lea.vmem %s5845_s12, %s3977_s28 [#allocation2]  }
 0x22a   : >> { %3543 = vst [vmem:[%s4810_s15 + $0x70] sm:$0xff] %v3542_v59  ;;  %3545 = vst [vmem:[%s4810_s15 + $0x78] sm:$0xff] %v3544_v19  ;;  %s3552_s15 = scalar_lea.vmem %s5895_s23, %s3977_s28  }
 0x22c PF: > { %s5970_s29 = sand.u32 15, %s6000_s17   ;;  %s3988_s30 = sshll.u32 %s5901_s25, 7 }
 0x22d   : > { %s3557_s4 = scalar_lea.vmem %s5845_s12, %s3988_s30 [#allocation2]   ;;  %s3559_s5 = scalar_lea.vmem %s5895_s23, %s3988_s30  }
 0x22e   : > { %p3982_p13 = scmp.le.s32.totalorder %s5970_s29, 0 }
 0x22f   : > { %s4824_s7 = smov (!%p3982_p13), %s3559_s5   ;;  %s4828_s8 = smov (!%p3982_p13), %s3557_s4  }
 0x230   : > { %3650 = sbr.rel (%p3982_p13) target bundleno = 577 (0x241), region = 127  ;;  %s4832_s9 = smov (!%p3982_p13), 0  }
 0x231   : > { %s4836_s10 = smov (!%p3982_p13), 0  }
 0x237 LB: >> { %v3569_v22 = vld [vmem:[%s4830_s8] sm:$0xff]  ;;  %s3571_s6 = sadd.s32 1, %s4834_s9  ;;  %s3563_s10 = sadd.s32 1, %s4838_s10   ;;  %s4838_s10 = sphi %s4836_s10, %s3563_s10   ;;  %s4834_s9 = sphi %s4832_s9, %s4833_s9   ;;  %s4830_s8 = sphi %s4828_s8, %s3576_s8   ;;  %s4826_s7 = sphi %s4824_s7, %s3577_s7  }
 0x238   : >> { %3570 = vst [vmem:[%s4826_s7] sm:$0xff] %v3569_v22  ;;  %p3572_p0 = scmp.ge.s32.totalorder %s3571_s6, %s5970_s29  ;;  %p3562_p1 = scmp.ge.s32.totalorder %s3563_s10, %s5970_s29 }
 0x23a   : >> { %s6004_s6 = smov (%p3572_p0, %s3571_s6), 0  ;;  %3565 = sbr.rel (!%p3562_p1) target bundleno = 567 (0x237), region = 133 }
 0x23b   : >> { %s3983_s11 = sshll.u32 %s6004_s6, 3  ;;  %s4833_s9 = smov %s6004_s6  }
 0x23c   : >> { %s3576_s8 = scalar_lea.vmem %s3557_s4, %s3983_s11 [#allocation2]   ;;  %s3577_s7 = scalar_lea.vmem %s3559_s5, %s3983_s11  }
 0x241 PF: > { %p10_p2 = scmp.ge.s32.totalorder %s4876_s16, 5   ;;  %s5996_s12 = smov %s4802_s13 }
 0x242   : > { %s5997_s13 = smov %s4884_s19  ;;  %s5998_s14 = smov %s4876_s16 }
 0x243   :  { %12 = sbr.rel (!%p10_p2) target bundleno = 2 (0x2), region = 144 }

</bundles_post_ra>
